<compile_context>
chip_gen: v5e
topology: v5e:2x2
jax: 0.10.0
libtpu: 0.0.40
codegen_flags: <defaults>
</compile_context>

<pallas_src>
import functools
import math

import numpy as np
import jax
import jax.numpy as jnp
from jax import lax
from jax.experimental import pallas as pl
from jax.experimental.pallas import tpu as pltpu


# --------------------------------------------------------------------------- #
# Kernel
# --------------------------------------------------------------------------- #
def fft_layer_kernel(x_ref, r2_ref, w2_ref, c2_ref, pred_ref, pexp_ref,
                     gamma_ref, beta_ref, o_ref, *, Fp):
    x = x_ref[...]                                                    # (L, N) f32

    # Fused ortho-rfft: one bf16 MXU matmul -> stacked [Xr; Xi].
    xf = jnp.dot(r2_ref[...], x.astype(jnp.bfloat16),
                 preferred_element_type=jnp.float32)                  # (2Fp, N) f32
    xr, xi = xf[:Fp], xf[Fp:]

    # Complex spectral weight (kept f32, runs on the VPU).
    w2 = w2_ref[...]
    wr, wi = w2[:Fp], w2[Fp:]
    hr = xr * wr - xi * wi
    hi = xr * wi + xi * wr
    h = jnp.concatenate([hr, hi], axis=0)                             # (2Fp, N)

    # Fused ortho-irfft (Hermitian fold baked into the basis): y = Ccos@Hr - Csin@Hi.
    y = jnp.dot(c2_ref[...], h.astype(jnp.bfloat16),
                preferred_element_type=jnp.float32)                   # (L, N) f32

    # dropout (eval) = identity; residual + LayerNorm(eps=1e-12) over hidden, f32.
    # Factored pooling: (L,N)@(N,nb)@(nb,N) instead of a dense (N,N) matmul.
    z = y + x
    mean = jnp.dot(jnp.dot(z, pred_ref[...], preferred_element_type=jnp.float32),
                   pexp_ref[...], preferred_element_type=jnp.float32)
    d = z - mean
    var = jnp.dot(jnp.dot(d * d, pred_ref[...], preferred_element_type=jnp.float32),
                  pexp_ref[...], preferred_element_type=jnp.float32)
    inv = lax.rsqrt(var + 1e-12)
    o_ref[...] = (d * inv) * gamma_ref[...] + beta_ref[...]


# --------------------------------------------------------------------------- #
# Cached constants (host-side, per static shape)
# --------------------------------------------------------------------------- #
@functools.lru_cache(maxsize=None)
def _dft_bases(L):
    """Stacked ortho rfft/irfft bases; built in f64 with an exact mod-L phase,
    cast to bf16 for the MXU. Returns (R2 (2Fp,L), C2 (L,2Fp), Fp)."""
    F = L // 2 + 1
    Fp = ((F + 7) // 8) * 8
    s = np.arange(L)
    f = np.arange(F)
    phase = (np.outer(f, s) % L).astype(np.float64) * (2.0 * np.pi / L)
    inv_sqrt_l = 1.0 / np.sqrt(float(L))

    acos = np.cos(phase) * inv_sqrt_l                                 # (F, L)
    asin = np.sin(phase) * inv_sqrt_l
    # Hermitian fold: DC (and Nyquist for even L) count once, all others twice.
    fold = np.full((F,), 2.0)
    fold[0] = 1.0
    if L % 2 == 0:
        fold[F - 1] = 1.0
    ccos = (np.cos(phase) * fold[:, None]).T * inv_sqrt_l             # (L, F)
    csin = (np.sin(phase) * fold[:, None]).T * inv_sqrt_l

    pad = Fp - F
    acos = np.pad(acos, ((0, pad), (0, 0)))
    asin = np.pad(asin, ((0, pad), (0, 0)))
    ccos = np.pad(ccos, ((0, 0), (0, pad)))
    csin = np.pad(csin, ((0, 0), (0, pad)))

    r2 = np.concatenate([acos, -asin], axis=0)                        # (2Fp, L)
    c2 = np.concatenate([ccos, -csin], axis=1)                        # (L, 2Fp)
    return (jnp.asarray(r2, dtype=jnp.bfloat16),
            jnp.asarray(c2, dtype=jnp.bfloat16),
            Fp)


@functools.lru_cache(maxsize=None)
def _ln_pool_factors(H, nb):
    """Factored LayerNorm pooling: mean = (z @ P_red) @ P_exp per hidden block."""
    p_red = np.kron(np.eye(nb), np.ones((H, 1)) / H)                  # (nb*H, nb)
    p_exp = np.kron(np.eye(nb), np.ones((1, H)))                      # (nb, nb*H)
    return jnp.asarray(p_red, jnp.float32), jnp.asarray(p_exp, jnp.float32)


def _pick_lane_tile(BH, H, target=1024):
    """Largest lane tile dividing B*H that is a multiple of H and 128 and
    <= target; falls back to the full width when no such tile exists."""
    unit = H * 128 // math.gcd(H, 128)
    if BH % unit != 0:
        return BH
    best = unit
    k = 2
    limit = min(BH, max(target, unit))
    while unit * k <= limit:
        if BH % (unit * k) == 0:
            best = unit * k
        k += 1
    return best


# --------------------------------------------------------------------------- #
# Wrapper
# --------------------------------------------------------------------------- #
@functools.partial(jax.jit, static_argnames=("Fp", "N_tile", "buffered"))
def _fft_layer_call(x, complex_weight, gamma, beta, r2, c2, p_red, p_exp,
                    *, Fp, N_tile, buffered):
    bs, n_nodes, L, H = x.shape
    B = bs * n_nodes
    BH = B * H
    F = L // 2 + 1
    nb = N_tile // H

    # lane-dense slab (L, B*H); residual & LayerNorm kept in f32.
    xs = (x.reshape(B, L, H).astype(jnp.float32)
           .transpose(1, 0, 2).reshape(L, BH))

    # Stacked spectral weights [Wr; Wi], padded to Fp, tiled only to one lane tile.
    wr = jnp.pad(complex_weight[0, :, :, 0].astype(jnp.float32), ((0, Fp - F), (0, 0)))
    wi = jnp.pad(complex_weight[0, :, :, 1].astype(jnp.float32), ((0, Fp - F), (0, 0)))
    w2 = jnp.tile(jnp.concatenate([wr, wi], axis=0), (1, nb))         # (2Fp, N_tile)

    gamma_t = jnp.tile(gamma.reshape(1, H).astype(jnp.float32), (1, nb))
    beta_t = jnp.tile(beta.reshape(1, H).astype(jnp.float32), (1, nb))

    const_kwargs = {"pipeline_mode": pl.Buffered(1)} if buffered else {}

    def const_spec(shape):
        # Grid-invariant block: single-buffered, stays resident across steps.
        return pl.BlockSpec(shape, lambda i: (0, 0), **const_kwargs)

    out = pl.pallas_call(
        functools.partial(fft_layer_kernel, Fp=Fp),
        out_shape=jax.ShapeDtypeStruct((L, BH), jnp.float32),
        grid_spec=pl.GridSpec(
            grid=(BH // N_tile,),
            in_specs=[
                pl.BlockSpec((L, N_tile), lambda i: (0, i)),   # x slab chunk
                const_spec((2 * Fp, L)),                       # rfft basis (bf16)
                const_spec((2 * Fp, N_tile)),                  # spectral weights (f32)
                const_spec((L, 2 * Fp)),                       # irfft basis (bf16)
                const_spec((N_tile, nb)),                      # LN reduce factor
                const_spec((nb, N_tile)),                      # LN expand factor
                const_spec((1, N_tile)),                       # gamma
                const_spec((1, N_tile)),                       # beta
            ],
            out_specs=pl.BlockSpec((L, N_tile), lambda i: (0, i)),
        ),
        compiler_params=pltpu.CompilerParams(
            dimension_semantics=("parallel",),
            vmem_limit_bytes=32 * 1024 * 1024),   # per-step working set << 32 MiB
    )(xs, r2, w2, c2, p_red, p_exp, gamma_t, beta_t)

    # undo the layout plumbing: (L, B*H) -> (bs, n_nodes, L, H)
    return (out.reshape(L, B, H).transpose(1, 0, 2)
               .reshape(bs, n_nodes, L, H).astype(x.dtype))


def fft_layer(x, complex_weight, gamma, beta):
    bs, n_nodes, L, H = x.shape
    BH = bs * n_nodes * H
    N_tile = _pick_lane_tile(BH, H)
    r2, c2, Fp = _dft_bases(L)
    p_red, p_exp = _ln_pool_factors(H, N_tile // H)
    args = (x, complex_weight, gamma, beta, r2, c2, p_red, p_exp)
    try:
        return _fft_layer_call(*args, Fp=Fp, N_tile=N_tile, buffered=True)
    except Exception:
        # Fallback for environments without BlockSpec(pipeline_mode=pl.Buffered(1)).
        return _fft_layer_call(*args, Fp=Fp, N_tile=N_tile, buffered=False)


# --------------------------------------------------------------------------- #
# Pure-JAX reference (mirrors the PyTorch forward, eval mode)
# --------------------------------------------------------------------------- #
def fft_layer_reference(x, complex_weight, gamma, beta):
    bs, n_nodes, L, H = x.shape
    h = jnp.fft.rfft(x, axis=2, norm="ortho")
    w = complex_weight[..., 0] + 1j * complex_weight[..., 1]   # (1, F, H)
    h = h * w[None]                                            # broadcast over (bs, n_nodes)
    h = jnp.fft.irfft(h, n=L, axis=2, norm="ortho")
    z = h + x
    mean = jnp.mean(z, axis=-1, keepdims=True)
    var = jnp.mean((z - mean) ** 2, axis=-1, keepdims=True)
    return (z - mean) / jnp.sqrt(var + 1e-12) * gamma + beta


if __name__ == "__main__":
    bs, n_nodes, seq_len, hidden = 2, 4, 16, 32
    F = seq_len // 2 + 1

    key = jax.random.PRNGKey(0)
    kx, kw = jax.random.split(key)
    x = jax.random.normal(kx, (bs, n_nodes, seq_len, hidden), dtype=jnp.float32)
    complex_weight = 0.02 * jax.random.normal(kw, (1, F, hidden, 2), dtype=jnp.float32)
    gamma = jnp.ones((hidden,), dtype=jnp.float32)   # LayerNorm default init
    beta = jnp.zeros((hidden,), dtype=jnp.float32)

    out = fft_layer(x, complex_weight, gamma, beta)
    out = jax.block_until_ready(out)

    ref = fft_layer_reference(x, complex_weight, gamma, beta)
    assert out.shape == ref.shape == (bs, n_nodes, seq_len, hidden)
    # FFT matmuls use bf16 MXU operands (residual/LayerNorm stay f32): 5e-3 tolerance.
    err = float(jnp.max(jnp.abs(out - ref)))
    assert jnp.allclose(out, ref, atol=5e-3, rtol=5e-3), err

    print("KERNEL_OK")
</pallas_src>

<mosaic_0001>
module attributes {stable_mosaic.version = 11 : i64} {
  func.func @fft_layer_kernel(%arg0: i32, %arg1: memref<16x256xf32, #tpu.memory_space<vmem>>, %arg2: memref<32x16xbf16, #tpu.memory_space<vmem>>, %arg3: memref<32x256xf32, #tpu.memory_space<vmem>>, %arg4: memref<16x32xbf16, #tpu.memory_space<vmem>>, %arg5: memref<256x8xf32, #tpu.memory_space<vmem>>, %arg6: memref<8x256xf32, #tpu.memory_space<vmem>>, %arg7: memref<1x256xf32, #tpu.memory_space<vmem>>, %arg8: memref<1x256xf32, #tpu.memory_space<vmem>>, %arg9: memref<16x256xf32, #tpu.memory_space<vmem>>) attributes {dimension_semantics = [#tpu.dimension_semantics<parallel>], iteration_bounds = array<i64: 1>, scalar_prefetch = 0 : i64, scratch_operands = 0 : i64, tpu.core_type = #tpu.core_type<tc>, window_params = [{transform_indices = @transform_0, window_bounds = array<i64: 16, 256>}, {pipeline_mode = #tpu.pipeline_mode<synchronous>, transform_indices = @transform_1, window_bounds = array<i64: 32, 16>}, {pipeline_mode = #tpu.pipeline_mode<synchronous>, transform_indices = @transform_2, window_bounds = array<i64: 32, 256>}, {pipeline_mode = #tpu.pipeline_mode<synchronous>, transform_indices = @transform_3, window_bounds = array<i64: 16, 32>}, {pipeline_mode = #tpu.pipeline_mode<synchronous>, transform_indices = @transform_4, window_bounds = array<i64: 256, 8>}, {pipeline_mode = #tpu.pipeline_mode<synchronous>, transform_indices = @transform_5, window_bounds = array<i64: 8, 256>}, {pipeline_mode = #tpu.pipeline_mode<synchronous>, transform_indices = @transform_6, window_bounds = array<i64: 1, 256>}, {pipeline_mode = #tpu.pipeline_mode<synchronous>, transform_indices = @transform_7, window_bounds = array<i64: 1, 256>}, {transform_indices = @transform_8, window_bounds = array<i64: 16, 256>}]} {
    %c0 = arith.constant 0 : index
    %c0_0 = arith.constant 0 : index
    %0 = vector.load %arg1[%c0, %c0_0] : memref<16x256xf32, #tpu.memory_space<vmem>>, vector<16x256xf32>
    %c0_1 = arith.constant 0 : index
    %c0_2 = arith.constant 0 : index
    %1 = vector.load %arg2[%c0_1, %c0_2] : memref<32x16xbf16, #tpu.memory_space<vmem>>, vector<32x16xbf16>
    %2 = arith.truncf %0 : vector<16x256xf32> to vector<16x256xbf16>
    %cst = arith.constant dense<0.000000e+00> : vector<32x256xf32>
    %3 = tpu.matmul %1, %2, %cst {dimension_numbers = #tpu.dot_dimension_numbers<[1], [0], [0], [1], [0, 0, 1, 1], [], []>} : vector<32x16xbf16>, vector<16x256xbf16>, vector<32x256xf32> -> vector<32x256xf32>
    %4 = vector.extract_strided_slice %3 {offsets = [0, 0], sizes = [16, 256], strides = [1, 1]} : vector<32x256xf32> to vector<16x256xf32>
    %5 = vector.extract_strided_slice %3 {offsets = [16, 0], sizes = [16, 256], strides = [1, 1]} : vector<32x256xf32> to vector<16x256xf32>
    %c0_3 = arith.constant 0 : index
    %c0_4 = arith.constant 0 : index
    %6 = vector.load %arg3[%c0_3, %c0_4] : memref<32x256xf32, #tpu.memory_space<vmem>>, vector<32x256xf32>
    %7 = vector.extract_strided_slice %6 {offsets = [0, 0], sizes = [16, 256], strides = [1, 1]} : vector<32x256xf32> to vector<16x256xf32>
    %8 = vector.extract_strided_slice %6 {offsets = [16, 0], sizes = [16, 256], strides = [1, 1]} : vector<32x256xf32> to vector<16x256xf32>
    %9 = arith.mulf %4, %7 : vector<16x256xf32>
    %10 = arith.mulf %5, %8 : vector<16x256xf32>
    %11 = arith.subf %9, %10 : vector<16x256xf32>
    %12 = arith.mulf %4, %8 : vector<16x256xf32>
    %13 = arith.mulf %5, %7 : vector<16x256xf32>
    %14 = arith.addf %12, %13 : vector<16x256xf32>
    %15 = tpu.concatenate %11, %14 in 0 : vector<16x256xf32>, vector<16x256xf32> -> vector<32x256xf32>
    %c0_5 = arith.constant 0 : index
    %c0_6 = arith.constant 0 : index
    %16 = vector.load %arg4[%c0_5, %c0_6] : memref<16x32xbf16, #tpu.memory_space<vmem>>, vector<16x32xbf16>
    %17 = arith.truncf %15 : vector<32x256xf32> to vector<32x256xbf16>
    %cst_7 = arith.constant dense<0.000000e+00> : vector<16x256xf32>
    %18 = tpu.matmul %16, %17, %cst_7 {dimension_numbers = #tpu.dot_dimension_numbers<[1], [0], [0], [1], [0, 0, 1, 1], [], []>} : vector<16x32xbf16>, vector<32x256xbf16>, vector<16x256xf32> -> vector<16x256xf32>
    %19 = arith.addf %18, %0 : vector<16x256xf32>
    %c0_8 = arith.constant 0 : index
    %c0_9 = arith.constant 0 : index
    %20 = vector.load %arg5[%c0_8, %c0_9] : memref<256x8xf32, #tpu.memory_space<vmem>>, vector<256x8xf32>
    %cst_10 = arith.constant dense<0.000000e+00> : vector<16x8xf32>
    %21 = tpu.matmul %19, %20, %cst_10 {dimension_numbers = #tpu.dot_dimension_numbers<[1], [0], [0], [1], [0, 0, 1, 1], [], []>} : vector<16x256xf32>, vector<256x8xf32>, vector<16x8xf32> -> vector<16x8xf32>
    %c0_11 = arith.constant 0 : index
    %c0_12 = arith.constant 0 : index
    %22 = vector.load %arg6[%c0_11, %c0_12] : memref<8x256xf32, #tpu.memory_space<vmem>>, vector<8x256xf32>
    %cst_13 = arith.constant dense<0.000000e+00> : vector<16x256xf32>
    %23 = tpu.matmul %21, %22, %cst_13 {dimension_numbers = #tpu.dot_dimension_numbers<[1], [0], [0], [1], [0, 0, 1, 1], [], []>} : vector<16x8xf32>, vector<8x256xf32>, vector<16x256xf32> -> vector<16x256xf32>
    %24 = arith.subf %19, %23 : vector<16x256xf32>
    %25 = arith.mulf %24, %24 : vector<16x256xf32>
    %c0_14 = arith.constant 0 : index
    %c0_15 = arith.constant 0 : index
    %26 = vector.load %arg5[%c0_14, %c0_15] : memref<256x8xf32, #tpu.memory_space<vmem>>, vector<256x8xf32>
    %cst_16 = arith.constant dense<0.000000e+00> : vector<16x8xf32>
    %27 = tpu.matmul %25, %26, %cst_16 {dimension_numbers = #tpu.dot_dimension_numbers<[1], [0], [0], [1], [0, 0, 1, 1], [], []>} : vector<16x256xf32>, vector<256x8xf32>, vector<16x8xf32> -> vector<16x8xf32>
    %c0_17 = arith.constant 0 : index
    %c0_18 = arith.constant 0 : index
    %28 = vector.load %arg6[%c0_17, %c0_18] : memref<8x256xf32, #tpu.memory_space<vmem>>, vector<8x256xf32>
    %cst_19 = arith.constant dense<0.000000e+00> : vector<16x256xf32>
    %29 = tpu.matmul %27, %28, %cst_19 {dimension_numbers = #tpu.dot_dimension_numbers<[1], [0], [0], [1], [0, 0, 1, 1], [], []>} : vector<16x8xf32>, vector<8x256xf32>, vector<16x256xf32> -> vector<16x256xf32>
    %cst_20 = arith.constant 9.99999996E-13 : f32
    %30 = vector.broadcast %cst_20 : f32 to vector<16x256xf32>
    %31 = arith.addf %29, %30 : vector<16x256xf32>
    %32 = math.rsqrt %31 : vector<16x256xf32>
    %33 = arith.mulf %24, %32 : vector<16x256xf32>
    %c0_21 = arith.constant 0 : index
    %c0_22 = arith.constant 0 : index
    %34 = vector.load %arg7[%c0_21, %c0_22] : memref<1x256xf32, #tpu.memory_space<vmem>>, vector<1x256xf32>
    %35 = vector.broadcast %34 : vector<1x256xf32> to vector<16x256xf32>
    %36 = arith.mulf %33, %35 : vector<16x256xf32>
    %c0_23 = arith.constant 0 : index
    %c0_24 = arith.constant 0 : index
    %37 = vector.load %arg8[%c0_23, %c0_24] : memref<1x256xf32, #tpu.memory_space<vmem>>, vector<1x256xf32>
    %38 = vector.broadcast %37 : vector<1x256xf32> to vector<16x256xf32>
    %39 = arith.addf %36, %38 : vector<16x256xf32>
    %c0_25 = arith.constant 0 : index
    %c0_26 = arith.constant 0 : index
    %40 = vector.load %arg9[%c0_25, %c0_26] : memref<16x256xf32, #tpu.memory_space<vmem>>, vector<16x256xf32>
    tpu.vector_store %arg9[%c0_25, %c0_26], %39 {strides = array<i32>} : memref<16x256xf32, #tpu.memory_space<vmem>>, vector<16x256xf32>,
    return
  }
  func.func @transform_0(%arg0: i32) -> (i32, i32) {
    %c0_i32 = arith.constant 0 : i32
    %c0_i32_0 = arith.constant 0 : i32
    return %c0_i32, %arg0 : i32, i32
  }
  func.func @transform_1(%arg0: i32) -> (i32, i32) {
    %c0_i32 = arith.constant 0 : i32
    %c0_i32_0 = arith.constant 0 : i32
    %c0_i32_1 = arith.constant 0 : i32
    return %c0_i32, %c0_i32_0 : i32, i32
  }
  func.func @transform_2(%arg0: i32) -> (i32, i32) {
    %c0_i32 = arith.constant 0 : i32
    %c0_i32_0 = arith.constant 0 : i32
    %c0_i32_1 = arith.constant 0 : i32
    return %c0_i32, %c0_i32_0 : i32, i32
  }
  func.func @transform_3(%arg0: i32) -> (i32, i32) {
    %c0_i32 = arith.constant 0 : i32
    %c0_i32_0 = arith.constant 0 : i32
    %c0_i32_1 = arith.constant 0 : i32
    return %c0_i32, %c0_i32_0 : i32, i32
  }
  func.func @transform_4(%arg0: i32) -> (i32, i32) {
    %c0_i32 = arith.constant 0 : i32
    %c0_i32_0 = arith.constant 0 : i32
    %c0_i32_1 = arith.constant 0 : i32
    return %c0_i32, %c0_i32_0 : i32, i32
  }
  func.func @transform_5(%arg0: i32) -> (i32, i32) {
    %c0_i32 = arith.constant 0 : i32
    %c0_i32_0 = arith.constant 0 : i32
    %c0_i32_1 = arith.constant 0 : i32
    return %c0_i32, %c0_i32_0 : i32, i32
  }
  func.func @transform_6(%arg0: i32) -> (i32, i32) {
    %c0_i32 = arith.constant 0 : i32
    %c0_i32_0 = arith.constant 0 : i32
    %c0_i32_1 = arith.constant 0 : i32
    return %c0_i32, %c0_i32_0 : i32, i32
  }
  func.func @transform_7(%arg0: i32) -> (i32, i32) {
    %c0_i32 = arith.constant 0 : i32
    %c0_i32_0 = arith.constant 0 : i32
    %c0_i32_1 = arith.constant 0 : i32
    return %c0_i32, %c0_i32_0 : i32, i32
  }
  func.func @transform_8(%arg0: i32) -> (i32, i32) {
    %c0_i32 = arith.constant 0 : i32
    %c0_i32_0 = arith.constant 0 : i32
    return %c0_i32, %arg0 : i32, i32
  }
}

module attributes {stable_mosaic.version = 11 : i64} {
  func.func @fft_layer_kernel(%arg0: i32, %arg1: memref<16x256xf32, #tpu.memory_space<vmem>>, %arg2: memref<32x16xbf16, #tpu.memory_space<vmem>>, %arg3: memref<32x256xf32, #tpu.memory_space<vmem>>, %arg4: memref<16x32xbf16, #tpu.memory_space<vmem>>, %arg5: memref<256x8xf32, #tpu.memory_space<vmem>>, %arg6: memref<8x256xf32, #tpu.memory_space<vmem>>, %arg7: memref<1x256xf32, #tpu.memory_space<vmem>>, %arg8: memref<1x256xf32, #tpu.memory_space<vmem>>, %arg9: memref<16x256xf32, #tpu.memory_space<vmem>>) attributes {dimension_semantics = [#tpu.dimension_semantics<parallel>], iteration_bounds = array<i64: 1>, scalar_prefetch = 0 : i64, scratch_operands = 0 : i64, tpu.core_type = #tpu.core_type<tc>, window_params = [{transform_indices = @transform_0, window_bounds = array<i64: 16, 256>}, {pipeline_mode = #tpu.pipeline_mode<synchronous>, transform_indices = @transform_1, window_bounds = array<i64: 32, 16>}, {pipeline_mode = #tpu.pipeline_mode<synchronous>, transform_indices = @transform_2, window_bounds = array<i64: 32, 256>}, {pipeline_mode = #tpu.pipeline_mode<synchronous>, transform_indices = @transform_3, window_bounds = array<i64: 16, 32>}, {pipeline_mode = #tpu.pipeline_mode<synchronous>, transform_indices = @transform_4, window_bounds = array<i64: 256, 8>}, {pipeline_mode = #tpu.pipeline_mode<synchronous>, transform_indices = @transform_5, window_bounds = array<i64: 8, 256>}, {pipeline_mode = #tpu.pipeline_mode<synchronous>, transform_indices = @transform_6, window_bounds = array<i64: 1, 256>}, {pipeline_mode = #tpu.pipeline_mode<synchronous>, transform_indices = @transform_7, window_bounds = array<i64: 1, 256>}, {transform_indices = @transform_8, window_bounds = array<i64: 16, 256>}]} {
    %c0 = arith.constant 0 : index
    %c0_0 = arith.constant 0 : index
    %0 = vector.load %arg1[%c0, %c0_0] : memref<16x256xf32, #tpu.memory_space<vmem>>, vector<16x256xf32>
    %c0_1 = arith.constant 0 : index
    %c0_2 = arith.constant 0 : index
    %1 = vector.load %arg2[%c0_1, %c0_2] : memref<32x16xbf16, #tpu.memory_space<vmem>>, vector<32x16xbf16>
    %2 = arith.truncf %0 : vector<16x256xf32> to vector<16x256xbf16>
    %cst = arith.constant dense<0.000000e+00> : vector<32x256xf32>
    %3 = tpu.matmul %1, %2, %cst {dimension_numbers = #tpu.dot_dimension_numbers<[1], [0], [0], [1], [0, 0, 1, 1], [], []>} : vector<32x16xbf16>, vector<16x256xbf16>, vector<32x256xf32> -> vector<32x256xf32>
    %4 = vector.extract_strided_slice %3 {offsets = [0, 0], sizes = [16, 256], strides = [1, 1]} : vector<32x256xf32> to vector<16x256xf32>
    %5 = vector.extract_strided_slice %3 {offsets = [16, 0], sizes = [16, 256], strides = [1, 1]} : vector<32x256xf32> to vector<16x256xf32>
    %c0_3 = arith.constant 0 : index
    %c0_4 = arith.constant 0 : index
    %6 = vector.load %arg3[%c0_3, %c0_4] : memref<32x256xf32, #tpu.memory_space<vmem>>, vector<32x256xf32>
    %7 = vector.extract_strided_slice %6 {offsets = [0, 0], sizes = [16, 256], strides = [1, 1]} : vector<32x256xf32> to vector<16x256xf32>
    %8 = vector.extract_strided_slice %6 {offsets = [16, 0], sizes = [16, 256], strides = [1, 1]} : vector<32x256xf32> to vector<16x256xf32>
    %9 = arith.mulf %4, %7 : vector<16x256xf32>
    %10 = arith.mulf %5, %8 : vector<16x256xf32>
    %11 = arith.subf %9, %10 : vector<16x256xf32>
    %12 = arith.mulf %4, %8 : vector<16x256xf32>
    %13 = arith.mulf %5, %7 : vector<16x256xf32>
    %14 = arith.addf %12, %13 : vector<16x256xf32>
    %15 = tpu.concatenate %11, %14 in 0 : vector<16x256xf32>, vector<16x256xf32> -> vector<32x256xf32>
    %c0_5 = arith.constant 0 : index
    %c0_6 = arith.constant 0 : index
    %16 = vector.load %arg4[%c0_5, %c0_6] : memref<16x32xbf16, #tpu.memory_space<vmem>>, vector<16x32xbf16>
    %17 = arith.truncf %15 : vector<32x256xf32> to vector<32x256xbf16>
    %cst_7 = arith.constant dense<0.000000e+00> : vector<16x256xf32>
    %18 = tpu.matmul %16, %17, %cst_7 {dimension_numbers = #tpu.dot_dimension_numbers<[1], [0], [0], [1], [0, 0, 1, 1], [], []>} : vector<16x32xbf16>, vector<32x256xbf16>, vector<16x256xf32> -> vector<16x256xf32>
    %19 = arith.addf %18, %0 : vector<16x256xf32>
    %c0_8 = arith.constant 0 : index
    %c0_9 = arith.constant 0 : index
    %20 = vector.load %arg5[%c0_8, %c0_9] : memref<256x8xf32, #tpu.memory_space<vmem>>, vector<256x8xf32>
    %cst_10 = arith.constant dense<0.000000e+00> : vector<16x8xf32>
    %21 = tpu.matmul %19, %20, %cst_10 {dimension_numbers = #tpu.dot_dimension_numbers<[1], [0], [0], [1], [0, 0, 1, 1], [], []>} : vector<16x256xf32>, vector<256x8xf32>, vector<16x8xf32> -> vector<16x8xf32>
    %c0_11 = arith.constant 0 : index
    %c0_12 = arith.constant 0 : index
    %22 = vector.load %arg6[%c0_11, %c0_12] : memref<8x256xf32, #tpu.memory_space<vmem>>, vector<8x256xf32>
    %cst_13 = arith.constant dense<0.000000e+00> : vector<16x256xf32>
    %23 = tpu.matmul %21, %22, %cst_13 {dimension_numbers = #tpu.dot_dimension_numbers<[1], [0], [0], [1], [0, 0, 1, 1], [], []>} : vector<16x8xf32>, vector<8x256xf32>, vector<16x256xf32> -> vector<16x256xf32>
    %24 = arith.subf %19, %23 : vector<16x256xf32>
    %25 = arith.mulf %24, %24 : vector<16x256xf32>
    %c0_14 = arith.constant 0 : index
    %c0_15 = arith.constant 0 : index
    %26 = vector.load %arg5[%c0_14, %c0_15] : memref<256x8xf32, #tpu.memory_space<vmem>>, vector<256x8xf32>
    %cst_16 = arith.constant dense<0.000000e+00> : vector<16x8xf32>
    %27 = tpu.matmul %25, %26, %cst_16 {dimension_numbers = #tpu.dot_dimension_numbers<[1], [0], [0], [1], [0, 0, 1, 1], [], []>} : vector<16x256xf32>, vector<256x8xf32>, vector<16x8xf32> -> vector<16x8xf32>
    %c0_17 = arith.constant 0 : index
    %c0_18 = arith.constant 0 : index
    %28 = vector.load %arg6[%c0_17, %c0_18] : memref<8x256xf32, #tpu.memory_space<vmem>>, vector<8x256xf32>
    %cst_19 = arith.constant dense<0.000000e+00> : vector<16x256xf32>
    %29 = tpu.matmul %27, %28, %cst_19 {dimension_numbers = #tpu.dot_dimension_numbers<[1], [0], [0], [1], [0, 0, 1, 1], [], []>} : vector<16x8xf32>, vector<8x256xf32>, vector<16x256xf32> -> vector<16x256xf32>
    %cst_20 = arith.constant 9.99999996E-13 : f32
    %30 = vector.broadcast %cst_20 : f32 to vector<16x256xf32>
    %31 = arith.addf %29, %30 : vector<16x256xf32>
    %32 = math.rsqrt %31 : vector<16x256xf32>
    %33 = arith.mulf %24, %32 : vector<16x256xf32>
    %c0_21 = arith.constant 0 : index
    %c0_22 = arith.constant 0 : index
    %34 = vector.load %arg7[%c0_21, %c0_22] : memref<1x256xf32, #tpu.memory_space<vmem>>, vector<1x256xf32>
    %35 = vector.broadcast %34 : vector<1x256xf32> to vector<16x256xf32>
    %36 = arith.mulf %33, %35 : vector<16x256xf32>
    %c0_23 = arith.constant 0 : index
    %c0_24 = arith.constant 0 : index
    %37 = vector.load %arg8[%c0_23, %c0_24] : memref<1x256xf32, #tpu.memory_space<vmem>>, vector<1x256xf32>
    %38 = vector.broadcast %37 : vector<1x256xf32> to vector<16x256xf32>
    %39 = arith.addf %36, %38 : vector<16x256xf32>
    %c0_25 = arith.constant 0 : index
    %c0_26 = arith.constant 0 : index
    %40 = vector.load %arg9[%c0_25, %c0_26] : memref<16x256xf32, #tpu.memory_space<vmem>>, vector<16x256xf32>
    tpu.vector_store %arg9[%c0_25, %c0_26], %39 {strides = array<i32>} : memref<16x256xf32, #tpu.memory_space<vmem>>, vector<16x256xf32>,
    return
  }
  func.func @transform_0(%arg0: i32) -> (i32, i32) {
    %c0_i32 = arith.constant 0 : i32
    %c0_i32_0 = arith.constant 0 : i32
    return %c0_i32, %arg0 : i32, i32
  }
  func.func @transform_1(%arg0: i32) -> (i32, i32) {
    %c0_i32 = arith.constant 0 : i32
    %c0_i32_0 = arith.constant 0 : i32
    %c0_i32_1 = arith.constant 0 : i32
    return %c0_i32, %c0_i32_0 : i32, i32
  }
  func.func @transform_2(%arg0: i32) -> (i32, i32) {
    %c0_i32 = arith.constant 0 : i32
    %c0_i32_0 = arith.constant 0 : i32
    %c0_i32_1 = arith.constant 0 : i32
    return %c0_i32, %c0_i32_0 : i32, i32
  }
  func.func @transform_3(%arg0: i32) -> (i32, i32) {
    %c0_i32 = arith.constant 0 : i32
    %c0_i32_0 = arith.constant 0 : i32
    %c0_i32_1 = arith.constant 0 : i32
    return %c0_i32, %c0_i32_0 : i32, i32
  }
  func.func @transform_4(%arg0: i32) -> (i32, i32) {
    %c0_i32 = arith.constant 0 : i32
    %c0_i32_0 = arith.constant 0 : i32
    %c0_i32_1 = arith.constant 0 : i32
    return %c0_i32, %c0_i32_0 : i32, i32
  }
  func.func @transform_5(%arg0: i32) -> (i32, i32) {
    %c0_i32 = arith.constant 0 : i32
    %c0_i32_0 = arith.constant 0 : i32
    %c0_i32_1 = arith.constant 0 : i32
    return %c0_i32, %c0_i32_0 : i32, i32
  }
  func.func @transform_6(%arg0: i32) -> (i32, i32) {
    %c0_i32 = arith.constant 0 : i32
    %c0_i32_0 = arith.constant 0 : i32
    %c0_i32_1 = arith.constant 0 : i32
    return %c0_i32, %c0_i32_0 : i32, i32
  }
  func.func @transform_7(%arg0: i32) -> (i32, i32) {
    %c0_i32 = arith.constant 0 : i32
    %c0_i32_0 = arith.constant 0 : i32
    %c0_i32_1 = arith.constant 0 : i32
    return %c0_i32, %c0_i32_0 : i32, i32
  }
  func.func @transform_8(%arg0: i32) -> (i32, i32) {
    %c0_i32 = arith.constant 0 : i32
    %c0_i32_0 = arith.constant 0 : i32
    return %c0_i32, %arg0 : i32, i32
  }
}

</mosaic_0001>

<bundles_post_ra>
// kernel: tile.17
= control target key start
LH: loop header
LB: loop body
LE: loop exit
PB: predicated region body
PF: predicated region fallthrough
CT: control target
= control target key end

     0   :  { %vm92_vm0 = vcmask 1047556   ;;  %s459_s14 = smov 96   ;;  %s460_s22 = smov 64   ;;  %vm3_vm1 = vcmask 261120   ;;  %vm96_vm2 = vcmask 1048320   ;;  %vm183_vm3 = vcmask 785920   ;;  %s896_s0 = inlined_call_operand.vmem [shape: f32[32,8,32], index: 0, kind: input, shape index: {}]   ;;  %s897_s1 = inlined_call_operand.vmem [shape: f32[32,256], index: 1, kind: output, shape index: {}]  }
   0x1   :  { %v392_v0 = vld [vmem:[%s896_s0 + $0x7] ss:$8 sm:$0xf]   ;;  %v387_v3 = vld [vmem:[%s896_s0 + $0x3] ss:$8 sm:$0xf]  }
   0x2   :  { %v393_v1 = vld [vmem:[%s896_s0 + $0x7] ss:$8 sm:$0xf0]   ;;  %v388_v4 = vld [vmem:[%s896_s0 + $0x3] ss:$8 sm:$0xf0]  }
   0x3   :  { %v114_v2 = vsel %vm92_vm0, %v393_v1, %v392_v0  ;;  %v93_v5 = vsel %vm92_vm0, %v388_v4, %v387_v3  ;;  %v395_v6 = vld [vmem:[%s896_s0 + $0x87] ss:$8 sm:$0xf]   ;;  %v389_v8 = vld [vmem:[%s896_s0 + $0x83] ss:$8 sm:$0xf]  }
   0x4   :  { %115 = vrot.lane.b32.xlu1 %v114_v2, %s459_s14  ;;  %94 = vrot.lane.b32.xlu0 %v93_v5, %s459_s14  ;;  %v396_v7 = vld [vmem:[%s896_s0 + $0x87] ss:$8 sm:$0xf0]   ;;  %v390_v9 = vld [vmem:[%s896_s0 + $0x83] ss:$8 sm:$0xf0]  }
   0x5   :  { %v398_v10 = vld [vmem:[%s896_s0 + $0x43] ss:$8 sm:$0xf]   ;;  %v125_v12 = vsel %vm92_vm0, %v396_v7, %v395_v6  ;;  %v103_v14 = vsel %vm92_vm0, %v390_v9, %v389_v8  ;;  %v407_v17 = vld [vmem:[%s896_s0 + $0xc7] ss:$8 sm:$0xf]  }
   0x6   :  { %v399_v11 = vld [vmem:[%s896_s0 + $0x43] ss:$8 sm:$0xf0]   ;;  %v408_v18 = vld [vmem:[%s896_s0 + $0xc7] ss:$8 sm:$0xf0]  }
   0x7   :  { %v136_v13 = vsel %vm92_vm0, %v399_v11, %v398_v10  ;;  %v401_v15 = vld [vmem:[%s896_s0 + $0xc3] ss:$8 sm:$0xf]   ;;  %v404_v19 = vld [vmem:[%s896_s0 + $0x47] ss:$8 sm:$0xf]   ;;  %v169_v22 = vsel %vm92_vm0, %v408_v18, %v407_v17 }
   0x8   :  { %137 = vrot.lane.b32.xlu2 %v136_v13, %s459_s14  ;;  %v402_v16 = vld [vmem:[%s896_s0 + $0xc3] ss:$8 sm:$0xf0]   ;;  %v405_v20 = vld [vmem:[%s896_s0 + $0x47] ss:$8 sm:$0xf0]  }
   0x9   :  { %v147_v21 = vsel %vm92_vm0, %v402_v16, %v401_v15  ;;  %v158_v23 = vsel %vm92_vm0, %v405_v20, %v404_v19  ;;  %v410_v24 = vld [vmem:[%s896_s0 + $0x2] ss:$8 sm:$0xf]   ;;  %v415_v26 = vld [vmem:[%s896_s0 + $0x6] ss:$8 sm:$0xf]  }
   0xa   :  { %v411_v25 = vld [vmem:[%s896_s0 + $0x2] ss:$8 sm:$0xf0]   ;;  %v416_v27 = vld [vmem:[%s896_s0 + $0x6] ss:$8 sm:$0xf0]  }
   0xb   :  { %v412_v28 = vld [vmem:[%s896_s0 + $0x82] ss:$8 sm:$0xf]   ;;  %v180_v30 = vsel %vm92_vm0, %v411_v25, %v410_v24  ;;  %v201_v31 = vsel %vm92_vm0, %v416_v27, %v415_v26  ;;  %v418_v33 = vld [vmem:[%s896_s0 + $0x86] ss:$8 sm:$0xf]  }
   0xc   :  { %126 = vrot.lane.b32.xlu1 %v125_v12, %s459_s14  ;;  %104 = vrot.lane.b32.xlu0 %v103_v14, %s459_s14  ;;  %v413_v29 = vld [vmem:[%s896_s0 + $0x82] ss:$8 sm:$0xf0]   ;;  %v419_v34 = vld [vmem:[%s896_s0 + $0x86] ss:$8 sm:$0xf0]  }
   0xd   :  { %v190_v32 = vsel %vm92_vm0, %v413_v29, %v412_v28  ;;  %v424_v35 = vld [vmem:[%s896_s0 + $0xc2] ss:$8 sm:$0xf]   ;;  %v212_v39 = vsel %vm92_vm0, %v419_v34, %v418_v33  ;;  %v427_v42 = vld [vmem:[%s896_s0 + $0x46] ss:$8 sm:$0xf]  }
   0xe   :  { %v425_v36 = vld [vmem:[%s896_s0 + $0xc2] ss:$8 sm:$0xf0]   ;;  %v428_v43 = vld [vmem:[%s896_s0 + $0x46] ss:$8 sm:$0xf0]  }
   0xf   :  { %v421_v37 = vld [vmem:[%s896_s0 + $0x42] ss:$8 sm:$0xf]   ;;  %v234_v40 = vsel %vm92_vm0, %v425_v36, %v424_v35  ;;  %v433_v44 = vld [vmem:[%s896_s0 + $0x1] ss:$8 sm:$0xf]   ;;  %v245_v48 = vsel %vm92_vm0, %v428_v43, %v427_v42 }
  0x10   :  { %148 = vrot.lane.b32.xlu2 %v147_v21, %s459_s14  ;;  %v422_v38 = vld [vmem:[%s896_s0 + $0x42] ss:$8 sm:$0xf0]   ;;  %v434_v45 = vld [vmem:[%s896_s0 + $0x1] ss:$8 sm:$0xf0]  }
  0x11   :  { %v223_v41 = vsel %vm92_vm0, %v422_v38, %v421_v37  ;;  %v430_v46 = vld [vmem:[%s896_s0 + $0xc6] ss:$8 sm:$0xf]   ;;  %v267_v49 = vsel %vm92_vm0, %v434_v45, %v433_v44  ;;  %s461_s18 = smov 32   ;;  %v2_v8 = vld [vmem:[%s896_s0] ss:$4 sm:$0xff]  }
  0x12   :  { %v431_v47 = vld [vmem:[%s896_s0 + $0xc6] ss:$8 sm:$0xf0]   ;;  %v435_v51 = vld [vmem:[%s896_s0 + $0x81] ss:$8 sm:$0xf]  }
  0x13   :  { %v256_v50 = vsel %vm92_vm0, %v431_v47, %v430_v46  ;;  %v436_v52 = vld [vmem:[%s896_s0 + $0x81] ss:$8 sm:$0xf0]   ;;  %v441_v53 = vld [vmem:[%s896_s0 + $0x85] ss:$8 sm:$0xf]  }
  0x14   :  { %170 = vrot.lane.b32.xlu1 %v169_v22, %s459_s14  ;;  %159 = vrot.lane.b32.xlu0 %v158_v23, %s459_s14  ;;  %v442_v54 = vld [vmem:[%s896_s0 + $0x85] ss:$8 sm:$0xf0]   ;;  %v277_v57 = vsel %vm92_vm0, %v436_v52, %v435_v51  ;;  %v444_v60 = vld [vmem:[%s896_s0 + $0x41] ss:$8 sm:$0xf]  }
  0x15   :  { %v438_v55 = vld [vmem:[%s896_s0 + $0x5] ss:$8 sm:$0xf]   ;;  %v299_v58 = vsel %vm92_vm0, %v442_v54, %v441_v53  ;;  %v445_v61 = vld [vmem:[%s896_s0 + $0x41] ss:$8 sm:$0xf0]  }
  0x16   :  { %v439_v56 = vld [vmem:[%s896_s0 + $0x5] ss:$8 sm:$0xf0]   ;;  %v447_v0 = vld [vmem:[%s896_s0 + $0xc1] ss:$8 sm:$0xf]   ;;  %v310_v2 = vsel %vm92_vm0, %v445_v61, %v444_v60 }
  0x17   :  { %v288_v59 = vsel %vm92_vm0, %v439_v56, %v438_v55  ;;  %v450_v62 = vld [vmem:[%s896_s0 + $0x45] ss:$8 sm:$0xf]   ;;  %v448_v1 = vld [vmem:[%s896_s0 + $0xc1] ss:$8 sm:$0xf0]  }
  0x18   :  { %181 = vrot.lane.b32.xlu2 %v180_v30, %s460_s22  ;;  %v451_v63 = vld [vmem:[%s896_s0 + $0x45] ss:$8 sm:$0xf0]   ;;  %v321_v4 = vsel %vm92_vm0, %v448_v1, %v447_v0  ;;  %4 = vst.msk [vmem:[%s897_s1] ss:$8 sm:$0x3] %vm3_vm1, %v2_v8  }
  0x19   :  { %v332_v3 = vsel %vm92_vm0, %v451_v63, %v450_v62  ;;  %v453_v5 = vld [vmem:[%s896_s0 + $0xc5] ss:$8 sm:$0xf]   ;;  %349 = vst.msk [vmem:[%s897_s1 - $0xf] ss:$8 sm:$0xc] %vm3_vm1, %v2_v8  }
  0x1a   :  { %v454_v6 = vld [vmem:[%s896_s0 + $0xc5] ss:$8 sm:$0xf0]   ;;  %v352_v9 = vld [vmem:[%s896_s0 + $0x20] ss:$4 sm:$0xff]   ;;  %vm270_vm4 = vcmask 523520  }
  0x1b   :  { %v343_v7 = vsel %vm92_vm0, %v454_v6, %v453_v5  ;;  %350 = vst.msk [vmem:[%s897_s1 - $0x1e] ss:$8 sm:$0x30] %vm3_vm1, %v2_v8   ;;  %v367_v10 = vld [vmem:[%s896_s0 + $0x80] ss:$4 sm:$0xff]  }
  0x1c   :  { %202 = vrot.lane.b32.xlu1 %v201_v31, %s460_s22  ;;  %191 = vrot.lane.b32.xlu0 %v190_v32, %s460_s22  ;;  %351 = vst.msk [vmem:[%s897_s1 - $0x2d] ss:$8 sm:$0xc0] %vm3_vm1, %v2_v8   ;;  %v372_v11 = vld [vmem:[%s896_s0 + $0xa0] ss:$4 sm:$0xff]  }
  0x1d   :  { %353 = vst.msk [vmem:[%s897_s1 + $0x4] ss:$8 sm:$0x3] %vm3_vm1, %v352_v9   ;;  %v357_v13 = vld [vmem:[%s896_s0 + $0x40] ss:$4 sm:$0xff]  }
  0x1e   :  { %354 = vst.msk [vmem:[%s897_s1 - $0xb] ss:$8 sm:$0xc] %vm3_vm1, %v352_v9   ;;  %v362_v14 = vld [vmem:[%s896_s0 + $0x60] ss:$4 sm:$0xff]  }
  0x1f   :  { %355 = vst.msk [vmem:[%s897_s1 - $0x1a] ss:$8 sm:$0x30] %vm3_vm1, %v352_v9   ;;  %v377_v16 = vld [vmem:[%s896_s0 + $0xc0] ss:$4 sm:$0xff]  }
  0x20   :  { %213 = vrot.lane.b32.xlu2 %v212_v39, %s460_s22  ;;  %356 = vst.msk [vmem:[%s897_s1 - $0x29] ss:$8 sm:$0xc0] %vm3_vm1, %v352_v9   ;;  %v382_v17 = vld [vmem:[%s896_s0 + $0xe0] ss:$4 sm:$0xff]  }
  0x21   :  { %368 = vst.msk [vmem:[%s897_s1 + $0x20] ss:$8 sm:$0x3] %vm3_vm1, %v367_v10  }
  0x22   :  { %369 = vst.msk [vmem:[%s897_s1 + $0x11] ss:$8 sm:$0xc] %vm3_vm1, %v367_v10  }
  0x23   :  { %370 = vst.msk [vmem:[%s897_s1 + $0x2] ss:$8 sm:$0x30] %vm3_vm1, %v367_v10  }
  0x24   :  { %235 = vrot.lane.b32.xlu1 %v234_v40, %s460_s22  ;;  %224 = vrot.lane.b32.xlu0 %v223_v41, %s460_s22  ;;  %371 = vst.msk [vmem:[%s897_s1 - $0xd] ss:$8 sm:$0xc0] %vm3_vm1, %v367_v10  }
  0x25   :  { %373 = vst.msk [vmem:[%s897_s1 + $0x24] ss:$8 sm:$0x3] %vm3_vm1, %v372_v11  }
  0x26   :  { %374 = vst.msk [vmem:[%s897_s1 + $0x15] ss:$8 sm:$0xc] %vm3_vm1, %v372_v11  }
  0x27   :  { %375 = vst.msk [vmem:[%s897_s1 + $0x6] ss:$8 sm:$0x30] %vm3_vm1, %v372_v11  }
  0x28   :  { %246 = vrot.lane.b32.xlu2 %v245_v48, %s460_s22  ;;  %376 = vst.msk [vmem:[%s897_s1 - $0x9] ss:$8 sm:$0xc0] %vm3_vm1, %v372_v11  }
  0x29   :  { %358 = vst.msk [vmem:[%s897_s1 + $0x10] ss:$8 sm:$0x3] %vm3_vm1, %v357_v13  }
  0x2a   :  { %359 = vst.msk [vmem:[%s897_s1 + $0x1] ss:$8 sm:$0xc] %vm3_vm1, %v357_v13  }
  0x2b   :  { %360 = vst.msk [vmem:[%s897_s1 - $0xe] ss:$8 sm:$0x30] %vm3_vm1, %v357_v13  }
  0x2c   :  { %268 = vrot.lane.b32.xlu1 %v267_v49, %s461_s18  ;;  %257 = vrot.lane.b32.xlu0 %v256_v50, %s460_s22  ;;  %361 = vst.msk [vmem:[%s897_s1 - $0x1d] ss:$8 sm:$0xc0] %vm3_vm1, %v357_v13  }
  0x2d   :  { %363 = vst.msk [vmem:[%s897_s1 + $0x14] ss:$8 sm:$0x3] %vm3_vm1, %v362_v14  }
  0x2e   :  { %364 = vst.msk [vmem:[%s897_s1 + $0x5] ss:$8 sm:$0xc] %vm3_vm1, %v362_v14  }
  0x2f   :  { %365 = vst.msk [vmem:[%s897_s1 - $0xa] ss:$8 sm:$0x30] %vm3_vm1, %v362_v14  }
  0x30   :  { %278 = vrot.lane.b32.xlu2 %v277_v57, %s461_s18  ;;  %366 = vst.msk [vmem:[%s897_s1 - $0x19] ss:$8 sm:$0xc0] %vm3_vm1, %v362_v14  }
  0x31   :  { %378 = vst.msk [vmem:[%s897_s1 + $0x30] ss:$8 sm:$0x3] %vm3_vm1, %v377_v16  }
  0x32   :  { %379 = vst.msk [vmem:[%s897_s1 + $0x21] ss:$8 sm:$0xc] %vm3_vm1, %v377_v16  }
  0x33   :  { %380 = vst.msk [vmem:[%s897_s1 + $0x12] ss:$8 sm:$0x30] %vm3_vm1, %v377_v16  }
  0x34   :  { %300 = vrot.lane.b32.xlu1 %v299_v58, %s461_s18  ;;  %289 = vrot.lane.b32.xlu0 %v288_v59, %s461_s18  ;;  %381 = vst.msk [vmem:[%s897_s1 + $0x3] ss:$8 sm:$0xc0] %vm3_vm1, %v377_v16  }
  0x35   :  { %383 = vst.msk [vmem:[%s897_s1 + $0x34] ss:$8 sm:$0x3] %vm3_vm1, %v382_v17  }
  0x36   :  { %384 = vst.msk [vmem:[%s897_s1 + $0x25] ss:$8 sm:$0xc] %vm3_vm1, %v382_v17  }
  0x37   :  { %385 = vst.msk [vmem:[%s897_s1 + $0x16] ss:$8 sm:$0x30] %vm3_vm1, %v382_v17  }
  0x38   :  { %311 = vrot.lane.b32.xlu2 %v310_v2, %s461_s18  ;;  %386 = vst.msk [vmem:[%s897_s1 + $0x7] ss:$8 sm:$0xc0] %vm3_vm1, %v382_v17  }
  0x3c   :  { %333 = vrot.lane.b32.xlu1 %v332_v3, %s461_s18  ;;  %322 = vrot.lane.b32.xlu0 %v321_v4, %s461_s18 }
  0x40   :  { %344 = vrot.lane.b32.xlu2 %v343_v7, %s461_s18 }
  0x62   :  { %v138_v12 = vpop.permute.xlu2 %137  }
  0x63   :  { %400 = vst.msk [vmem:[%s897_s1 + $0x10] sm:$0xff] %vm96_vm2, %v138_v12  }
  0x6a   :  { %v149_v15 = vpop.permute.xlu2 %148  }
  0x6b   :  { %403 = vst.msk [vmem:[%s897_s1 + $0x30] sm:$0xff] %vm96_vm2, %v149_v15  }
  0x72   :  { %v182_v18 = vpop.permute.xlu2 %181  }
  0x76   :  { %v116_v19 = vpop.permute.xlu1 %115   ;;  %v95_v20 = vpop.permute.xlu0 %94  }
  0x77   :  { %394 = vst.msk [vmem:[%s897_s1 + $0x8] sm:$0xff] %vm96_vm2, %v116_v19  }
  0x78   :  { %97 = vst.msk [vmem:[%s897_s1] sm:$0xff] %vm96_vm2, %v95_v20  }
  0x79   :  { %184 = vst.msk [vmem:[%s897_s1] sm:$0xff] %vm183_vm3, %v182_v18  }
  0x7a   :  { %v214_v21 = vpop.permute.xlu2 %213  }
  0x7e   :  { %v127_v22 = vpop.permute.xlu1 %126   ;;  %v105_v23 = vpop.permute.xlu0 %104  }
  0x7f   :  { %397 = vst.msk [vmem:[%s897_s1 + $0x28] sm:$0xff] %vm96_vm2, %v127_v22  }
  0x80   :  { %420 = vst.msk [vmem:[%s897_s1 + $0x28] sm:$0xff] %vm183_vm3, %v214_v21  }
  0x81   :  { %391 = vst.msk [vmem:[%s897_s1 + $0x20] sm:$0xff] %vm96_vm2, %v105_v23  }
  0x82   :  { %v247_v24 = vpop.permute.xlu2 %246  }
  0x86   :  { %v171_v25 = vpop.permute.xlu1 %170   ;;  %v160_v26 = vpop.permute.xlu0 %159  }
  0x87   :  { %409 = vst.msk [vmem:[%s897_s1 + $0x38] sm:$0xff] %vm96_vm2, %v171_v25  }
  0x88   :  { %406 = vst.msk [vmem:[%s897_s1 + $0x18] sm:$0xff] %vm96_vm2, %v160_v26  }
  0x89   :  { %429 = vst.msk [vmem:[%s897_s1 + $0x18] sm:$0xff] %vm183_vm3, %v247_v24  }
  0x8a   :  { %v279_v27 = vpop.permute.xlu2 %278  }
  0x8e   :  { %v203_v28 = vpop.permute.xlu1 %202   ;;  %v192_v29 = vpop.permute.xlu0 %191  }
  0x8f   :  { %417 = vst.msk [vmem:[%s897_s1 + $0x8] sm:$0xff] %vm183_vm3, %v203_v28  }
  0x90   :  { %414 = vst.msk [vmem:[%s897_s1 + $0x20] sm:$0xff] %vm183_vm3, %v192_v29  }
  0x91   :  { %437 = vst.msk [vmem:[%s897_s1 + $0x20] sm:$0xff] %vm270_vm4, %v279_v27  }
  0x92   :  { %v312_v30 = vpop.permute.xlu2 %311  }
  0x96   :  { %v236_v31 = vpop.permute.xlu1 %235   ;;  %v225_v32 = vpop.permute.xlu0 %224  }
  0x97   :  { %426 = vst.msk [vmem:[%s897_s1 + $0x30] sm:$0xff] %vm183_vm3, %v236_v31  }
  0x98   :  { %423 = vst.msk [vmem:[%s897_s1 + $0x10] sm:$0xff] %vm183_vm3, %v225_v32  }
  0x99   :  { %446 = vst.msk [vmem:[%s897_s1 + $0x10] sm:$0xff] %vm270_vm4, %v312_v30  }
  0x9a   :  { %v345_v33 = vpop.permute.xlu2 %344  }
  0x9e   :  { %v269_v34 = vpop.permute.xlu1 %268   ;;  %v258_v35 = vpop.permute.xlu0 %257  }
  0x9f   :  { %271 = vst.msk [vmem:[%s897_s1] sm:$0xff] %vm270_vm4, %v269_v34  }
  0xa0   :  { %432 = vst.msk [vmem:[%s897_s1 + $0x38] sm:$0xff] %vm183_vm3, %v258_v35  }
  0xa1   :  { %455 = vst.msk [vmem:[%s897_s1 + $0x38] sm:$0xff] %vm270_vm4, %v345_v33  }
  0xa6   :  { %v301_v36 = vpop.permute.xlu1 %300   ;;  %v290_v37 = vpop.permute.xlu0 %289  }
  0xa7   :  { %443 = vst.msk [vmem:[%s897_s1 + $0x28] sm:$0xff] %vm270_vm4, %v301_v36  }
  0xa8   :  { %440 = vst.msk [vmem:[%s897_s1 + $0x8] sm:$0xff] %vm270_vm4, %v290_v37  }
  0xae   :  { %v334_v38 = vpop.permute.xlu1 %333   ;;  %v323_v39 = vpop.permute.xlu0 %322  }
  0xaf   :  { %452 = vst.msk [vmem:[%s897_s1 + $0x18] sm:$0xff] %vm270_vm4, %v334_v38  }
  0xb0   :  { %449 = vst.msk [vmem:[%s897_s1 + $0x30] sm:$0xff] %vm270_vm4, %v323_v39  }

// kernel: _fft_layer_call.1
= control target key start
LH: loop header
LB: loop body
LE: loop exit
PB: predicated region body
PF: predicated region fallthrough
CT: control target
= control target key end

     0   :  { %vm50_vm0 = vcmask 130048   ;;  %vm138_vm1 = vcmask 261120   ;;  %vm250_vm2 = vcmask 64512   ;;  %s888_s0 = inlined_call_operand.vmem [shape: f32[16,256], index: 0, kind: input, shape index: {}]   ;;  %s889_s1 = inlined_call_operand.vmem [shape: bf16[32,16], index: 1, kind: input, shape index: {}]   ;;  %s890_s4 = inlined_call_operand.vmem [shape: f32[256,8], index: 4, kind: input, shape index: {}]   ;;  %s891_s2 = inlined_call_operand.vmem [shape: f32[32,256], index: 2, kind: input, shape index: {}]   ;;  %s892_s3 = inlined_call_operand.vmem [shape: bf16[16,32], index: 3, kind: input, shape index: {}]   ;;  %s893_s5 = inlined_call_operand.vmem [shape: f32[8,256], index: 5, kind: input, shape index: {}]   ;;  %s894_s6 = inlined_call_operand.vmem [shape: f32[1,256], index: 6, kind: input, shape index: {}]   ;;  %s895_s7 = inlined_call_operand.vmem [shape: f32[1,256], index: 7, kind: input, shape index: {}]   ;;  %s896_s8 = inlined_call_operand.vmem [shape: f32[16,256], index: 8, kind: output, shape index: {}]  }
   0x1   :  { %v566_v0 = vld [vmem:[%s888_s0] sm:$0xff]  ;;  %v571_v1 = vld [vmem:[%s888_s0 + $0x10] sm:$0xff]  ;;  %v576_v2 = vld [vmem:[%s888_s0 + $0x8] sm:$0xff] }
   0x2   :  { %v38_v3 = vpack.c.bf16 %v571_v1, %v566_v0  ;;  %v583_v4 = vld [vmem:[%s888_s0 + $0x18] sm:$0xff]  ;;  %v507_v6 = vld [vmem:[%s889_s1] sm:$0xff]  ;;  %v508_v7 = vld [vmem:[%s889_s1 + $0x8] sm:$0xff] }
   0x3   :  { %v39_v5 = vpack.c.bf16 %v583_v4, %v576_v2  ;;  %v600_v10 = vld [vmem:[%s890_s4 + $0x78] sm:$0xff]  ;;  %v610_v12 = vld [vmem:[%s890_s4 + $0x70] sm:$0xff]  ;;  %v622_v16 = vld [vmem:[%s890_s4 + $0x68] sm:$0xff] }
   0x4   :  { %64 = vmatpush.bf16.msra.mxu0 %v38_v3  ;;  %v605_v11 = vld [vmem:[%s890_s4 + $0xf8] sm:$0xff]  ;;  %v617_v14 = vld [vmem:[%s890_s4 + $0xf0] sm:$0xff]  ;;  %v627_v17 = vld [vmem:[%s890_s4 + $0xe8] sm:$0xff] }
   0x5   :  { %83 = vmatpush.bf16.msra.mxu1 %v39_v5  ;;  %v634_v18 = vld [vmem:[%s890_s4 + $0x60] sm:$0xff]  ;;  %v646_v20 = vld [vmem:[%s890_s4 + $0x58] sm:$0xff]  ;;  %v658_v22 = vld [vmem:[%s890_s4 + $0x50] sm:$0xff] }
   0x6   :  { %v639_v19 = vld [vmem:[%s890_s4 + $0xe0] sm:$0xff]  ;;  %v651_v21 = vld [vmem:[%s890_s4 + $0xd8] sm:$0xff]  ;;  %v663_v23 = vld [vmem:[%s890_s4 + $0xd0] sm:$0xff] }
   0x7   :  { %489 = vmatmul.msk.bf16.vlgmr.msra.gmra.mxu0 %vm50_vm0, %v507_v6  ;;  %v670_v26 = vld [vmem:[%s890_s4 + $0x48] sm:$0xff]  ;;  %v682_v28 = vld [vmem:[%s890_s4 + $0x40] sm:$0xff]  ;;  %v703_v33 = vld [vmem:[%s890_s4 + $0x38] sm:$0xff] }
   0x8   :  { %491 = vmatmul.msk.bf16.vlgmr.msra.gmra.mxu1 %vm50_vm0, %v507_v6  ;;  %202 = vmatpush.msrb.mxu0 %v600_v10  ;;  %v675_v27 = vld [vmem:[%s890_s4 + $0xc8] sm:$0xff]  ;;  %v687_v29 = vld [vmem:[%s890_s4 + $0xc0] sm:$0xff]  ;;  %v708_v34 = vld [vmem:[%s890_s4 + $0xb8] sm:$0xff] }
   0x9   :  { %225 = vmatpush.msrb.mxu1 %v605_v11  ;;  %v95_v30 = vld [vmem:[%s891_s2] sm:$0xff]  ;;  %v100_v32 = vld [vmem:[%s891_s2 + $0x28] sm:$0xff]  ;;  %v97_v36 = vld [vmem:[%s891_s2 + $0x10] sm:$0xff] }
   0xa   :  { %203 = vmatpush.msrb.mxu0 %v610_v12  ;;  %v99_v31 = vld [vmem:[%s891_s2 + $0x20] sm:$0xff]  ;;  %v96_v35 = vld [vmem:[%s891_s2 + $0x8] sm:$0xff]  ;;  %v101_v37 = vld [vmem:[%s891_s2 + $0x30] sm:$0xff] }
   0xb   :  { %226 = vmatpush.msrb.mxu1 %v617_v14  ;;  %v102_v38 = vld [vmem:[%s891_s2 + $0x38] sm:$0xff]  ;;  %v727_v40 = vld [vmem:[%s890_s4 + $0x30] sm:$0xff]  ;;  %v744_v52 = vld [vmem:[%s890_s4 + $0x28] sm:$0xff] }
   0xc   :  { %204 = vmatpush.msrb.mxu0 %v622_v16  ;;  %v732_v41 = vld [vmem:[%s890_s4 + $0xb0] sm:$0xff]  ;;  %v98_v44 = vld [vmem:[%s891_s2 + $0x18] sm:$0xff]  ;;  %v749_v53 = vld [vmem:[%s890_s4 + $0xa8] sm:$0xff] }
   0xd   :  { %227 = vmatpush.msrb.mxu1 %v627_v17  ;;  %v756_v61 = vld [vmem:[%s890_s4 + $0x20] sm:$0xff] }
   0xe   :  { %205 = vmatpush.msrb.mxu0 %v634_v18  ;;  %v761_v62 = vld [vmem:[%s890_s4 + $0xa0] sm:$0xff] }
   0xf   :  { %228 = vmatpush.msrb.mxu1 %v639_v19 }
  0x10   :  { %206 = vmatpush.msrb.mxu0 %v646_v20 }
  0x11   :  { %229 = vmatpush.msrb.mxu1 %v651_v21 }
  0x12   :  { %207 = vmatpush.msrb.mxu0 %v658_v22 }
  0x13   :  { %230 = vmatpush.msrb.mxu1 %v663_v23 }
  0x14   :  { %208 = vmatpush.msrb.mxu0 %v670_v26 }
  0x15   :  { %231 = vmatpush.msrb.mxu1 %v675_v27 }
  0x16   :  { %209 = vmatpush.msrb.mxu0 %v682_v28 }
  0x17   :  { %490 = vmatmul.msk.bf16.gmra.mxu0 %vm50_vm0, %v508_v7  ;;  %232 = vmatpush.msrb.mxu1 %v687_v29 }
  0x18   :  { %492 = vmatmul.msk.bf16.gmra.mxu1 %vm50_vm0, %v508_v7  ;;  %210 = vmatpush.msrb.mxu0 %v703_v33 }
  0x19   :  { %233 = vmatpush.msrb.mxu1 %v708_v34 }
  0x1a   :  { %211 = vmatpush.msrb.mxu0 %v727_v40 }
  0x1b   :  { %234 = vmatpush.msrb.mxu1 %v732_v41 }
  0x1c   :  { %212 = vmatpush.msrb.mxu0 %v744_v52 }
  0x1d   :  { %235 = vmatpush.msrb.mxu1 %v749_v53 }
  0x1e   :  { %213 = vmatpush.msrb.mxu0 %v756_v61 }
  0x1f   :  { %236 = vmatpush.msrb.mxu1 %v761_v62 }
  0x84   :  { %v593_v8 = vpop.f32.mrf.mxu0 }
  0x85   :  { %v595_v9 = vpop.f32.mrf.mxu1  ;;  %v115_v42 = vmul.f32 %v99_v31, %v593_v8  ;;  %v103_v6 = vmul.f32 %v95_v30, %v593_v8 }
  0x86   :  { %v116_v43 = vmul.f32 %v100_v32, %v595_v9 }
  0x8c   :  { %v68_v13 = vpop.f32.mrf.mxu0 }
  0x8d   :  { %v87_v15 = vpop.f32.mrf.mxu1  ;;  %v105_v47 = vmul.f32 %v97_v36, %v68_v13  ;;  %v117_v48 = vmul.f32 %v101_v37, %v68_v13 }
  0x8e   :  { %v118_v54 = vmul.f32 %v102_v38, %v87_v15  ;;  %v106_v57 = vmul.f32 %v98_v44, %v87_v15  ;;  %v769_v15 = vld [vmem:[%s890_s4 + $0x18] sm:$0xff] }
  0x8f   :  { %214 = vmatpush.msrb.mxu0 %v769_v15 }
  0x94   :  { %v71_v24 = vpop.f32.mrf.mxu0 }
  0x95   :  { %v90_v25 = vpop.f32.mrf.mxu1  ;;  %v119_v39 = vmul.f32 %v95_v30, %v71_v24  ;;  %v107_v58 = vmul.f32 %v99_v31, %v71_v24  ;;  %v104_v24 = vmul.f32 %v96_v35, %v595_v9  ;;  %v782_v30 = vld [vmem:[%s890_s4 + $0x10] sm:$0xff] }
  0x96   :  { %v120_v45 = vmul.f32 %v96_v35, %v90_v25  ;;  %v108_v63 = vmul.f32 %v100_v32, %v90_v25  ;;  %v777_v25 = vld [vmem:[%s890_s4 + $0x98] sm:$0xff]  ;;  %v188_v32 = vld [vmem:[%s890_s4 + $0x90] sm:$0xff]  ;;  %215 = vmatpush.msrb.mxu0 %v782_v30 }
  0x97   :  { %v123_v59 = vadd.f32 %v119_v39, %v115_v42  ;;  %v111_v8 = vsub.f32 %v103_v6, %v107_v58  ;;  %237 = vmatpush.msrb.mxu1 %v777_v25  ;;  %v509_v39 = vld [vmem:[%s892_s3] sm:$0xff]  ;;  %v187_v42 = vld [vmem:[%s890_s4 + $0x88] sm:$0xff] }
  0x98   :  { %v124_v3 = vadd.f32 %v120_v45, %v116_v43  ;;  %v112_v9 = vsub.f32 %v104_v24, %v108_v63  ;;  %v170_v43 = vld [vmem:[%s890_s4] sm:$0xff] }
  0x99   :  { %238 = vmatpush.msrb.mxu1 %v188_v32  ;;  %v248_v45 = vld [vmem:[%s893_s5] sm:$0xff] }
  0x9b   :  { %239 = vmatpush.msrb.mxu1 %v187_v42 }
  0x9c   :  { %v73_v46 = vpop.f32.mrf.mxu0 }
  0x9d   :  { %v109_v49 = vmul.f32 %v101_v37, %v73_v46  ;;  %v121_v50 = vmul.f32 %v97_v36, %v73_v46  ;;  %v92_v51 = vpop.f32.mrf.mxu1  ;;  %v171_v37 = vld [vmem:[%s890_s4 + $0x8] sm:$0xff] }
  0x9e   :  { %v110_v55 = vmul.f32 %v102_v38, %v92_v51  ;;  %v122_v56 = vmul.f32 %v98_v44, %v92_v51  ;;  %216 = vmatpush.msrb.mxu0 %v171_v37  ;;  %v186_v44 = vld [vmem:[%s890_s4 + $0x80] sm:$0xff]  ;;  %v249_v46 = vld [vmem:[%s893_s5 + $0x8] sm:$0xff] }
  0x9f   :  { %v125_v60 = vadd.f32 %v121_v50, %v117_v48  ;;  %v113_v13 = vsub.f32 %v105_v47, %v109_v49  ;;  %240 = vmatpush.msrb.mxu1 %v186_v44 }
  0xa0   :  { %v126_v5 = vadd.f32 %v122_v56, %v118_v54  ;;  %v114_v36 = vsub.f32 %v106_v57, %v110_v55  ;;  %217 = vmatpush.msrb.mxu0 %v170_v43 }
  0xa1   :  { %v131_v7 = vpack.c.bf16 %v125_v60, %v123_v59  ;;  %v129_v35 = vpack.c.bf16 %v113_v13, %v111_v8  ;;  %401 = vmatpush.msra.mxu1 %v249_v46 }
  0xa2   :  { %v132_v31 = vpack.c.bf16 %v126_v5, %v124_v3  ;;  %v130_v38 = vpack.c.bf16 %v114_v36, %v112_v9  ;;  %378 = vmatpush.msra.mxu0 %v248_v45  ;;  %v453_v36 = vld [vmem:[%s894_s6] sm:$0x3] }
  0xa3   :  { %148 = vmatpush.bf16.msra.mxu2 %v131_v7 }
  0xa4   :  { %162 = vmatpush.bf16.msra.mxu3 %v132_v31 }
  0xa7   :  { %149 = vmatpush.bf16.msra.mxu2 %v129_v35 }
  0xa8   :  { %163 = vmatpush.bf16.msra.mxu3 %v130_v38 }
  0xaa   :  { %497 = vmatmul.msk.bf16.vlgmr.msra.gmra.mxu2 %vm138_vm1, %v509_v39 }
  0xab   :  { %498 = vmatmul.msk.bf16.vlgmr.msra.gmra.mxu3 %vm138_vm1, %v509_v39  ;;  %272 = vmatpush.msrb.mxu2 %v248_v45 }
  0xac   :  { %295 = vmatpush.msrb.mxu3 %v249_v46 }
  0xad   :  { %311 = vmatpush.msra.mxu2 %v600_v10 }
  0xae   :  { %334 = vmatpush.msra.mxu3 %v605_v11 }
  0xaf   :  { %312 = vmatpush.msra.mxu2 %v610_v12 }
  0xb0   :  { %335 = vmatpush.msra.mxu3 %v617_v14 }
  0xb1   :  { %313 = vmatpush.msra.mxu2 %v622_v16 }
  0xb2   :  { %336 = vmatpush.msra.mxu3 %v627_v17 }
  0xb3   :  { %314 = vmatpush.msra.mxu2 %v634_v18 }
  0xb4   :  { %337 = vmatpush.msra.mxu3 %v639_v19 }
  0xb5   :  { %315 = vmatpush.msra.mxu2 %v646_v20 }
  0xb6   :  { %338 = vmatpush.msra.mxu3 %v651_v21 }
  0xb7   :  { %316 = vmatpush.msra.mxu2 %v658_v22 }
  0xb8   :  { %339 = vmatpush.msra.mxu3 %v663_v23 }
  0xb9   :  { %317 = vmatpush.msra.mxu2 %v670_v26 }
  0xba   :  { %340 = vmatpush.msra.mxu3 %v675_v27 }
  0xbb   :  { %318 = vmatpush.msra.mxu2 %v682_v28 }
  0xbc   :  { %341 = vmatpush.msra.mxu3 %v687_v29 }
  0xbd   :  { %319 = vmatpush.msra.mxu2 %v703_v33 }
  0xbe   :  { %342 = vmatpush.msra.mxu3 %v708_v34 }
  0xbf   :  { %320 = vmatpush.msra.mxu2 %v727_v40 }
  0xc0   :  { %343 = vmatpush.msra.mxu3 %v732_v41 }
  0xc1   :  { %321 = vmatpush.msra.mxu2 %v744_v52 }
  0xc2   :  { %344 = vmatpush.msra.mxu3 %v749_v53 }
  0xc3   :  { %322 = vmatpush.msra.mxu2 %v756_v61 }
  0xc4   :  { %345 = vmatpush.msra.mxu3 %v761_v62 }
  0xc5   :  { %323 = vmatpush.msra.mxu2 %v769_v15 }
  0xc6   :  { %346 = vmatpush.msra.mxu3 %v777_v25 }
  0xc7   :  { %324 = vmatpush.msra.mxu2 %v782_v30 }
  0xc8   :  { %347 = vmatpush.msra.mxu3 %v188_v32  ;;  %v463_v32 = vld [vmem:[%s895_s7] sm:$0x3] }
  0xc9   :  { %325 = vmatpush.msra.mxu2 %v171_v37  ;;  %v455_v37 = vperm.slane %v453_v36, 0  ;;  %v465_v46 = vperm.slane %v463_v32, 0 }
  0xca   :  { %348 = vmatpush.msra.mxu3 %v187_v42 }
  0xcb   :  { %326 = vmatpush.msra.mxu2 %v170_v43  ;;  %v456_v43 = vperm.slane %v453_v36, 1 }
  0xcc   :  { %349 = vmatpush.msra.mxu3 %v186_v44 }
 0x12d   :  { %v151_v10 = vpop.f32.mrf.mxu2 }
 0x12e   :  { %v152_v11 = vadd.f32 %v151_v10, %v566_v0  ;;  %v165_v12 = vpop.f32.mrf.mxu3 }
 0x12f   :  { %v166_v14 = vadd.f32 %v165_v12, %v576_v2 }
 0x130   :  { %218 = vmatmul.f32.vlgmr.msrb.gmra.mxu0 %v152_v11 }
 0x131   :  { %241 = vmatmul.f32.vlgmr.msrb.gmra.mxu1 %v166_v14 }
 0x135   :  { %v153_v16 = vpop.f32.mrf.mxu2 }
 0x136   :  { %v154_v0 = vadd.f32 %v153_v16, %v571_v1  ;;  %v167_v2 = vpop.f32.mrf.mxu3 }
 0x137   :  { %v168_v17 = vadd.f32 %v167_v2, %v583_v4 }
 0x138   :  { %221 = vmatmul.f32.gmra.mxu0 %v154_v0 }
 0x139   :  { %244 = vmatmul.f32.gmra.mxu1 %v168_v17 }
 0x1ad   :  { %v219_v18 = vpop.f32.mrf.mxu0 }
 0x1ae   :  { %v242_v19 = vpop.f32.mrf.mxu1 }
 0x1af   :  { %v243_v20 = vadd.f32 %v242_v19, %v219_v18 }
 0x1b1   :  { %499 = vmatmul.msk.f32.vlgmr.msrb.gmra.mxu2 %vm250_vm2, %v243_v20  ;;  %501 = vmatmul.msk.f32.vlgmr.msrb.gmra.mxu3 %vm250_vm2, %v243_v20 }
 0x1b5   :  { %v222_v21 = vpop.f32.mrf.mxu0 }
 0x1b6   :  { %v245_v1 = vpop.f32.mrf.mxu1 }
 0x1b7   :  { %v246_v22 = vadd.f32 %v245_v1, %v222_v21 }
 0x1b9   :  { %500 = vmatmul.msk.f32.gmra.mxu2 %vm250_vm2, %v246_v22  ;;  %502 = vmatmul.msk.f32.gmra.mxu3 %vm250_vm2, %v246_v22 }
 0x234   :  { %v274_v4 = vpop.f32.mrf.mxu2  ;;  %v297_v23 = vpop.f32.mrf.mxu3 }
 0x235   :  { %v846_v26 = vsub.f32 %v152_v11, %v274_v4  ;;  %v848_v27 = vsub.f32 %v166_v14, %v297_v23  ;;  %v466_v14 = vperm.slane %v463_v32, 1 }
 0x237   :  { %v307_v28 = vmul.f32 %v846_v26, %v846_v26  ;;  %v308_v29 = vmul.f32 %v848_v27, %v848_v27 }
 0x239   :  { %327 = vmatmul.f32.vlgmr.msra.gmra.mxu2 %v307_v28  ;;  %350 = vmatmul.f32.vlgmr.msra.gmra.mxu3 %v308_v29 }
 0x23c   :  { %v277_v33 = vpop.f32.mrf.mxu2  ;;  %v300_v34 = vpop.f32.mrf.mxu3 }
 0x23d   :  { %v854_v40 = vsub.f32 %v154_v0, %v277_v33  ;;  %v856_v41 = vsub.f32 %v168_v17, %v300_v34 }
 0x23f   :  { %v309_v47 = vmul.f32 %v854_v40, %v854_v40  ;;  %v310_v48 = vmul.f32 %v856_v41, %v856_v41 }
 0x241   :  { %330 = vmatmul.f32.gmra.mxu2 %v309_v47  ;;  %353 = vmatmul.f32.gmra.mxu3 %v310_v48 }
 0x2bc   :  { %v328_v49 = vpop.f32.mrf.mxu2  ;;  %v351_v50 = vpop.f32.mrf.mxu3 }
 0x2bd   :  { %v352_v51 = vadd.f32 %v351_v50, %v328_v49 }
 0x2bf   :  { %503 = vmatmul.msk.f32.vlgmr.msra.gmra.mxu0 %vm250_vm2, %v352_v51  ;;  %505 = vmatmul.msk.f32.vlgmr.msra.gmra.mxu1 %vm250_vm2, %v352_v51 }
 0x2c4   :  { %v331_v52 = vpop.f32.mrf.mxu2  ;;  %v354_v53 = vpop.f32.mrf.mxu3 }
 0x2c5   :  { %v355_v54 = vadd.f32 %v354_v53, %v331_v52 }
 0x2c7   :  { %504 = vmatmul.msk.f32.gmra.mxu0 %vm250_vm2, %v355_v54  ;;  %506 = vmatmul.msk.f32.gmra.mxu1 %vm250_vm2, %v355_v54 }
 0x33c   :  { %v380_v55 = vpop.f32.mrf.mxu0  ;;  %v403_v56 = vpop.f32.mrf.mxu1 }
 0x33d   :  { %v381_v57 = vadd.f32 1e-12, %v380_v55  ;;  %v404_v58 = vadd.f32 1e-12, %v403_v56 }
 0x33f   :  { %510 = vrsqrt.f32 %v381_v57  ;;  %vm415_vm5 = vweird.f32 %v381_v57  ;;  %vm425_vm7 = vweird.f32 %v404_v58 }
 0x340   :  { %512 = vrsqrt.f32 %v404_v58 }
 0x344   :  { %v383_v59 = vpop.f32.mrf.mxu0  ;;  %v406_v60 = vpop.f32.mrf.mxu1 }
 0x345   :  { %v511_v61 = vpop.eup %510  ;;  %v384_v62 = vadd.f32 1e-12, %v383_v59  ;;  %v407_v63 = vadd.f32 1e-12, %v406_v60 }
 0x346   :  { %v513_v3 = vpop.eup %512  ;;  %v410_v5 = vmul.f32 %v511_v61, %v381_v57  ;;  %vm416_vm3 = vweird.f32 %v511_v61 }
 0x347   :  { %v420_v6 = vmul.f32 %v513_v3, %v404_v58  ;;  %514 = vrsqrt.f32 %v384_v62  ;;  %vm426_vm4 = vweird.f32 %v513_v3  ;;  %vm417_vm6 = vmor %vm415_vm5, %vm416_vm3  ;;  %vm435_vm11 = vweird.f32 %v384_v62 }
 0x348   :  { %v411_v7 = vmul.f32 %v511_v61, %v410_v5  ;;  %516 = vrsqrt.f32 %v407_v63  ;;  %vm427_vm8 = vmor %vm425_vm7, %vm426_vm4  ;;  %vm445_vm13 = vweird.f32 %v407_v63 }
 0x349   :  { %v421_v13 = vmul.f32 %v513_v3, %v420_v6 }
 0x34a   :  { %v412_v15 = vmul.f32 0.5, %v411_v7 }
 0x34b   :  { %v422_v24 = vmul.f32 0.5, %v421_v13 }
 0x34c   :  { %v413_v31 = vsub.f32 1.5, %v412_v15 }
 0x34d   :  { %v515_v25 = vpop.eup %514  ;;  %v423_v8 = vsub.f32 1.5, %v422_v24 }
 0x34e   :  { %v517_v30 = vpop.eup %516  ;;  %v414_v9 = vmul.f32 %v511_v61, %v413_v31  ;;  %v430_v35 = vmul.f32 %v515_v25, %v384_v62  ;;  %vm436_vm9 = vweird.f32 %v515_v25 }
 0x34f   :  { %v424_v38 = vmul.f32 %v513_v3, %v423_v8  ;;  %v440_v39 = vmul.f32 %v517_v30, %v407_v63  ;;  %vm446_vm10 = vweird.f32 %v517_v30  ;;  %vm437_vm12 = vmor %vm435_vm11, %vm436_vm9 }
 0x350   :  { %v418_v42 = vsel %vm417_vm6, %v511_v61, %v414_v9  ;;  %v431_v44 = vmul.f32 %v515_v25, %v430_v35  ;;  %vm447_vm14 = vmor %vm445_vm13, %vm446_vm10 }
 0x351   :  { %v449_v45 = vmul.f32 %v418_v42, %v846_v26  ;;  %v428_v10 = vsel %vm427_vm8, %v513_v3, %v424_v38  ;;  %v441_v11 = vmul.f32 %v517_v30, %v440_v39 }
 0x352   :  { %v450_v12 = vmul.f32 %v428_v10, %v848_v27  ;;  %v432_v16 = vmul.f32 0.5, %v431_v44 }
 0x353   :  { %v459_v0 = vmul.f32 %v455_v37, %v449_v45  ;;  %v442_v2 = vmul.f32 0.5, %v441_v11 }
 0x354   :  { %v460_v17 = vmul.f32 %v456_v43, %v450_v12  ;;  %v433_v18 = vsub.f32 1.5, %v432_v16 }
 0x355   :  { %v469_v19 = vadd.f32 %v465_v46, %v459_v0  ;;  %v443_v20 = vsub.f32 1.5, %v442_v2 }
 0x356   :  { %v470_v21 = vadd.f32 %v466_v14, %v460_v17  ;;  %v434_v1 = vmul.f32 %v515_v25, %v433_v18 }
 0x357   :  { %473 = vst [vmem:[%s896_s8] sm:$0xff] %v469_v19  ;;  %v444_v22 = vmul.f32 %v517_v30, %v443_v20 }
 0x358   :  { %474 = vst [vmem:[%s896_s8 + $0x8] sm:$0xff] %v470_v21  ;;  %v438_v4 = vsel %vm437_vm12, %v515_v25, %v434_v1 }
 0x359   :  { %v451_v23 = vmul.f32 %v438_v4, %v854_v40  ;;  %v448_v26 = vsel %vm447_vm14, %v517_v30, %v444_v22 }
 0x35a   :  { %v452_v27 = vmul.f32 %v448_v26, %v856_v41 }
 0x35b   :  { %v461_v28 = vmul.f32 %v455_v37, %v451_v23 }
 0x35c   :  { %v462_v29 = vmul.f32 %v456_v43, %v452_v27 }
 0x35d   :  { %v471_v33 = vadd.f32 %v465_v46, %v461_v28 }
 0x35e   :  { %v472_v34 = vadd.f32 %v466_v14, %v462_v29 }
 0x35f   :  { %475 = vst [vmem:[%s896_s8 + $0x10] sm:$0xff] %v471_v33 }
 0x360   :  { %476 = vst [vmem:[%s896_s8 + $0x18] sm:$0xff] %v472_v34 }

// kernel: tile.17
= control target key start
LH: loop header
LB: loop body
LE: loop exit
PB: predicated region body
PF: predicated region fallthrough
CT: control target
= control target key end

     0   :  { %vm92_vm0 = vcmask 1047556   ;;  %s459_s14 = smov 96   ;;  %s460_s22 = smov 64   ;;  %vm3_vm1 = vcmask 261120   ;;  %vm96_vm2 = vcmask 1048320   ;;  %vm183_vm3 = vcmask 785920   ;;  %s896_s0 = inlined_call_operand.vmem [shape: f32[32,8,32], index: 0, kind: input, shape index: {}]   ;;  %s897_s1 = inlined_call_operand.vmem [shape: f32[32,256], index: 1, kind: output, shape index: {}]  }
   0x1   :  { %v392_v0 = vld [vmem:[%s896_s0 + $0x7] ss:$8 sm:$0xf]   ;;  %v387_v3 = vld [vmem:[%s896_s0 + $0x3] ss:$8 sm:$0xf]  }
   0x2   :  { %v393_v1 = vld [vmem:[%s896_s0 + $0x7] ss:$8 sm:$0xf0]   ;;  %v388_v4 = vld [vmem:[%s896_s0 + $0x3] ss:$8 sm:$0xf0]  }
   0x3   :  { %v114_v2 = vsel %vm92_vm0, %v393_v1, %v392_v0  ;;  %v93_v5 = vsel %vm92_vm0, %v388_v4, %v387_v3  ;;  %v395_v6 = vld [vmem:[%s896_s0 + $0x87] ss:$8 sm:$0xf]   ;;  %v389_v8 = vld [vmem:[%s896_s0 + $0x83] ss:$8 sm:$0xf]  }
   0x4   :  { %115 = vrot.lane.b32.xlu1 %v114_v2, %s459_s14  ;;  %94 = vrot.lane.b32.xlu0 %v93_v5, %s459_s14  ;;  %v396_v7 = vld [vmem:[%s896_s0 + $0x87] ss:$8 sm:$0xf0]   ;;  %v390_v9 = vld [vmem:[%s896_s0 + $0x83] ss:$8 sm:$0xf0]  }
   0x5   :  { %v398_v10 = vld [vmem:[%s896_s0 + $0x43] ss:$8 sm:$0xf]   ;;  %v125_v12 = vsel %vm92_vm0, %v396_v7, %v395_v6  ;;  %v103_v14 = vsel %vm92_vm0, %v390_v9, %v389_v8  ;;  %v407_v17 = vld [vmem:[%s896_s0 + $0xc7] ss:$8 sm:$0xf]  }
   0x6   :  { %v399_v11 = vld [vmem:[%s896_s0 + $0x43] ss:$8 sm:$0xf0]   ;;  %v408_v18 = vld [vmem:[%s896_s0 + $0xc7] ss:$8 sm:$0xf0]  }
   0x7   :  { %v136_v13 = vsel %vm92_vm0, %v399_v11, %v398_v10  ;;  %v401_v15 = vld [vmem:[%s896_s0 + $0xc3] ss:$8 sm:$0xf]   ;;  %v404_v19 = vld [vmem:[%s896_s0 + $0x47] ss:$8 sm:$0xf]   ;;  %v169_v22 = vsel %vm92_vm0, %v408_v18, %v407_v17 }
   0x8   :  { %137 = vrot.lane.b32.xlu2 %v136_v13, %s459_s14  ;;  %v402_v16 = vld [vmem:[%s896_s0 + $0xc3] ss:$8 sm:$0xf0]   ;;  %v405_v20 = vld [vmem:[%s896_s0 + $0x47] ss:$8 sm:$0xf0]  }
   0x9   :  { %v147_v21 = vsel %vm92_vm0, %v402_v16, %v401_v15  ;;  %v158_v23 = vsel %vm92_vm0, %v405_v20, %v404_v19  ;;  %v410_v24 = vld [vmem:[%s896_s0 + $0x2] ss:$8 sm:$0xf]   ;;  %v415_v26 = vld [vmem:[%s896_s0 + $0x6] ss:$8 sm:$0xf]  }
   0xa   :  { %v411_v25 = vld [vmem:[%s896_s0 + $0x2] ss:$8 sm:$0xf0]   ;;  %v416_v27 = vld [vmem:[%s896_s0 + $0x6] ss:$8 sm:$0xf0]  }
   0xb   :  { %v412_v28 = vld [vmem:[%s896_s0 + $0x82] ss:$8 sm:$0xf]   ;;  %v180_v30 = vsel %vm92_vm0, %v411_v25, %v410_v24  ;;  %v201_v31 = vsel %vm92_vm0, %v416_v27, %v415_v26  ;;  %v418_v33 = vld [vmem:[%s896_s0 + $0x86] ss:$8 sm:$0xf]  }
   0xc   :  { %126 = vrot.lane.b32.xlu1 %v125_v12, %s459_s14  ;;  %104 = vrot.lane.b32.xlu0 %v103_v14, %s459_s14  ;;  %v413_v29 = vld [vmem:[%s896_s0 + $0x82] ss:$8 sm:$0xf0]   ;;  %v419_v34 = vld [vmem:[%s896_s0 + $0x86] ss:$8 sm:$0xf0]  }
   0xd   :  { %v190_v32 = vsel %vm92_vm0, %v413_v29, %v412_v28  ;;  %v424_v35 = vld [vmem:[%s896_s0 + $0xc2] ss:$8 sm:$0xf]   ;;  %v212_v39 = vsel %vm92_vm0, %v419_v34, %v418_v33  ;;  %v427_v42 = vld [vmem:[%s896_s0 + $0x46] ss:$8 sm:$0xf]  }
   0xe   :  { %v425_v36 = vld [vmem:[%s896_s0 + $0xc2] ss:$8 sm:$0xf0]   ;;  %v428_v43 = vld [vmem:[%s896_s0 + $0x46] ss:$8 sm:$0xf0]  }
   0xf   :  { %v421_v37 = vld [vmem:[%s896_s0 + $0x42] ss:$8 sm:$0xf]   ;;  %v234_v40 = vsel %vm92_vm0, %v425_v36, %v424_v35  ;;  %v433_v44 = vld [vmem:[%s896_s0 + $0x1] ss:$8 sm:$0xf]   ;;  %v245_v48 = vsel %vm92_vm0, %v428_v43, %v427_v42 }
  0x10   :  { %148 = vrot.lane.b32.xlu2 %v147_v21, %s459_s14  ;;  %v422_v38 = vld [vmem:[%s896_s0 + $0x42] ss:$8 sm:$0xf0]   ;;  %v434_v45 = vld [vmem:[%s896_s0 + $0x1] ss:$8 sm:$0xf0]  }
  0x11   :  { %v223_v41 = vsel %vm92_vm0, %v422_v38, %v421_v37  ;;  %v430_v46 = vld [vmem:[%s896_s0 + $0xc6] ss:$8 sm:$0xf]   ;;  %v267_v49 = vsel %vm92_vm0, %v434_v45, %v433_v44  ;;  %s461_s18 = smov 32   ;;  %v2_v8 = vld [vmem:[%s896_s0] ss:$4 sm:$0xff]  }
  0x12   :  { %v431_v47 = vld [vmem:[%s896_s0 + $0xc6] ss:$8 sm:$0xf0]   ;;  %v435_v51 = vld [vmem:[%s896_s0 + $0x81] ss:$8 sm:$0xf]  }
  0x13   :  { %v256_v50 = vsel %vm92_vm0, %v431_v47, %v430_v46  ;;  %v436_v52 = vld [vmem:[%s896_s0 + $0x81] ss:$8 sm:$0xf0]   ;;  %v441_v53 = vld [vmem:[%s896_s0 + $0x85] ss:$8 sm:$0xf]  }
  0x14   :  { %170 = vrot.lane.b32.xlu1 %v169_v22, %s459_s14  ;;  %159 = vrot.lane.b32.xlu0 %v158_v23, %s459_s14  ;;  %v442_v54 = vld [vmem:[%s896_s0 + $0x85] ss:$8 sm:$0xf0]   ;;  %v277_v57 = vsel %vm92_vm0, %v436_v52, %v435_v51  ;;  %v444_v60 = vld [vmem:[%s896_s0 + $0x41] ss:$8 sm:$0xf]  }
  0x15   :  { %v438_v55 = vld [vmem:[%s896_s0 + $0x5] ss:$8 sm:$0xf]   ;;  %v299_v58 = vsel %vm92_vm0, %v442_v54, %v441_v53  ;;  %v445_v61 = vld [vmem:[%s896_s0 + $0x41] ss:$8 sm:$0xf0]  }
  0x16   :  { %v439_v56 = vld [vmem:[%s896_s0 + $0x5] ss:$8 sm:$0xf0]   ;;  %v447_v0 = vld [vmem:[%s896_s0 + $0xc1] ss:$8 sm:$0xf]   ;;  %v310_v2 = vsel %vm92_vm0, %v445_v61, %v444_v60 }
  0x17   :  { %v288_v59 = vsel %vm92_vm0, %v439_v56, %v438_v55  ;;  %v450_v62 = vld [vmem:[%s896_s0 + $0x45] ss:$8 sm:$0xf]   ;;  %v448_v1 = vld [vmem:[%s896_s0 + $0xc1] ss:$8 sm:$0xf0]  }
  0x18   :  { %181 = vrot.lane.b32.xlu2 %v180_v30, %s460_s22  ;;  %v451_v63 = vld [vmem:[%s896_s0 + $0x45] ss:$8 sm:$0xf0]   ;;  %v321_v4 = vsel %vm92_vm0, %v448_v1, %v447_v0  ;;  %4 = vst.msk [vmem:[%s897_s1] ss:$8 sm:$0x3] %vm3_vm1, %v2_v8  }
  0x19   :  { %v332_v3 = vsel %vm92_vm0, %v451_v63, %v450_v62  ;;  %v453_v5 = vld [vmem:[%s896_s0 + $0xc5] ss:$8 sm:$0xf]   ;;  %349 = vst.msk [vmem:[%s897_s1 - $0xf] ss:$8 sm:$0xc] %vm3_vm1, %v2_v8  }
  0x1a   :  { %v454_v6 = vld [vmem:[%s896_s0 + $0xc5] ss:$8 sm:$0xf0]   ;;  %v352_v9 = vld [vmem:[%s896_s0 + $0x20] ss:$4 sm:$0xff]   ;;  %vm270_vm4 = vcmask 523520  }
  0x1b   :  { %v343_v7 = vsel %vm92_vm0, %v454_v6, %v453_v5  ;;  %350 = vst.msk [vmem:[%s897_s1 - $0x1e] ss:$8 sm:$0x30] %vm3_vm1, %v2_v8   ;;  %v367_v10 = vld [vmem:[%s896_s0 + $0x80] ss:$4 sm:$0xff]  }
  0x1c   :  { %202 = vrot.lane.b32.xlu1 %v201_v31, %s460_s22  ;;  %191 = vrot.lane.b32.xlu0 %v190_v32, %s460_s22  ;;  %351 = vst.msk [vmem:[%s897_s1 - $0x2d] ss:$8 sm:$0xc0] %vm3_vm1, %v2_v8   ;;  %v372_v11 = vld [vmem:[%s896_s0 + $0xa0] ss:$4 sm:$0xff]  }
  0x1d   :  { %353 = vst.msk [vmem:[%s897_s1 + $0x4] ss:$8 sm:$0x3] %vm3_vm1, %v352_v9   ;;  %v357_v13 = vld [vmem:[%s896_s0 + $0x40] ss:$4 sm:$0xff]  }
  0x1e   :  { %354 = vst.msk [vmem:[%s897_s1 - $0xb] ss:$8 sm:$0xc] %vm3_vm1, %v352_v9   ;;  %v362_v14 = vld [vmem:[%s896_s0 + $0x60] ss:$4 sm:$0xff]  }
  0x1f   :  { %355 = vst.msk [vmem:[%s897_s1 - $0x1a] ss:$8 sm:$0x30] %vm3_vm1, %v352_v9   ;;  %v377_v16 = vld [vmem:[%s896_s0 + $0xc0] ss:$4 sm:$0xff]  }
  0x20   :  { %213 = vrot.lane.b32.xlu2 %v212_v39, %s460_s22  ;;  %356 = vst.msk [vmem:[%s897_s1 - $0x29] ss:$8 sm:$0xc0] %vm3_vm1, %v352_v9   ;;  %v382_v17 = vld [vmem:[%s896_s0 + $0xe0] ss:$4 sm:$0xff]  }
  0x21   :  { %368 = vst.msk [vmem:[%s897_s1 + $0x20] ss:$8 sm:$0x3] %vm3_vm1, %v367_v10  }
  0x22   :  { %369 = vst.msk [vmem:[%s897_s1 + $0x11] ss:$8 sm:$0xc] %vm3_vm1, %v367_v10  }
  0x23   :  { %370 = vst.msk [vmem:[%s897_s1 + $0x2] ss:$8 sm:$0x30] %vm3_vm1, %v367_v10  }
  0x24   :  { %235 = vrot.lane.b32.xlu1 %v234_v40, %s460_s22  ;;  %224 = vrot.lane.b32.xlu0 %v223_v41, %s460_s22  ;;  %371 = vst.msk [vmem:[%s897_s1 - $0xd] ss:$8 sm:$0xc0] %vm3_vm1, %v367_v10  }
  0x25   :  { %373 = vst.msk [vmem:[%s897_s1 + $0x24] ss:$8 sm:$0x3] %vm3_vm1, %v372_v11  }
  0x26   :  { %374 = vst.msk [vmem:[%s897_s1 + $0x15] ss:$8 sm:$0xc] %vm3_vm1, %v372_v11  }
  0x27   :  { %375 = vst.msk [vmem:[%s897_s1 + $0x6] ss:$8 sm:$0x30] %vm3_vm1, %v372_v11  }
  0x28   :  { %246 = vrot.lane.b32.xlu2 %v245_v48, %s460_s22  ;;  %376 = vst.msk [vmem:[%s897_s1 - $0x9] ss:$8 sm:$0xc0] %vm3_vm1, %v372_v11  }
  0x29   :  { %358 = vst.msk [vmem:[%s897_s1 + $0x10] ss:$8 sm:$0x3] %vm3_vm1, %v357_v13  }
  0x2a   :  { %359 = vst.msk [vmem:[%s897_s1 + $0x1] ss:$8 sm:$0xc] %vm3_vm1, %v357_v13  }
  0x2b   :  { %360 = vst.msk [vmem:[%s897_s1 - $0xe] ss:$8 sm:$0x30] %vm3_vm1, %v357_v13  }
  0x2c   :  { %268 = vrot.lane.b32.xlu1 %v267_v49, %s461_s18  ;;  %257 = vrot.lane.b32.xlu0 %v256_v50, %s460_s22  ;;  %361 = vst.msk [vmem:[%s897_s1 - $0x1d] ss:$8 sm:$0xc0] %vm3_vm1, %v357_v13  }
  0x2d   :  { %363 = vst.msk [vmem:[%s897_s1 + $0x14] ss:$8 sm:$0x3] %vm3_vm1, %v362_v14  }
  0x2e   :  { %364 = vst.msk [vmem:[%s897_s1 + $0x5] ss:$8 sm:$0xc] %vm3_vm1, %v362_v14  }
  0x2f   :  { %365 = vst.msk [vmem:[%s897_s1 - $0xa] ss:$8 sm:$0x30] %vm3_vm1, %v362_v14  }
  0x30   :  { %278 = vrot.lane.b32.xlu2 %v277_v57, %s461_s18  ;;  %366 = vst.msk [vmem:[%s897_s1 - $0x19] ss:$8 sm:$0xc0] %vm3_vm1, %v362_v14  }
  0x31   :  { %378 = vst.msk [vmem:[%s897_s1 + $0x30] ss:$8 sm:$0x3] %vm3_vm1, %v377_v16  }
  0x32   :  { %379 = vst.msk [vmem:[%s897_s1 + $0x21] ss:$8 sm:$0xc] %vm3_vm1, %v377_v16  }
  0x33   :  { %380 = vst.msk [vmem:[%s897_s1 + $0x12] ss:$8 sm:$0x30] %vm3_vm1, %v377_v16  }
  0x34   :  { %300 = vrot.lane.b32.xlu1 %v299_v58, %s461_s18  ;;  %289 = vrot.lane.b32.xlu0 %v288_v59, %s461_s18  ;;  %381 = vst.msk [vmem:[%s897_s1 + $0x3] ss:$8 sm:$0xc0] %vm3_vm1, %v377_v16  }
  0x35   :  { %383 = vst.msk [vmem:[%s897_s1 + $0x34] ss:$8 sm:$0x3] %vm3_vm1, %v382_v17  }
  0x36   :  { %384 = vst.msk [vmem:[%s897_s1 + $0x25] ss:$8 sm:$0xc] %vm3_vm1, %v382_v17  }
  0x37   :  { %385 = vst.msk [vmem:[%s897_s1 + $0x16] ss:$8 sm:$0x30] %vm3_vm1, %v382_v17  }
  0x38   :  { %311 = vrot.lane.b32.xlu2 %v310_v2, %s461_s18  ;;  %386 = vst.msk [vmem:[%s897_s1 + $0x7] ss:$8 sm:$0xc0] %vm3_vm1, %v382_v17  }
  0x3c   :  { %333 = vrot.lane.b32.xlu1 %v332_v3, %s461_s18  ;;  %322 = vrot.lane.b32.xlu0 %v321_v4, %s461_s18 }
  0x40   :  { %344 = vrot.lane.b32.xlu2 %v343_v7, %s461_s18 }
  0x62   :  { %v138_v12 = vpop.permute.xlu2 %137  }
  0x63   :  { %400 = vst.msk [vmem:[%s897_s1 + $0x10] sm:$0xff] %vm96_vm2, %v138_v12  }
  0x6a   :  { %v149_v15 = vpop.permute.xlu2 %148  }
  0x6b   :  { %403 = vst.msk [vmem:[%s897_s1 + $0x30] sm:$0xff] %vm96_vm2, %v149_v15  }
  0x72   :  { %v182_v18 = vpop.permute.xlu2 %181  }
  0x76   :  { %v116_v19 = vpop.permute.xlu1 %115   ;;  %v95_v20 = vpop.permute.xlu0 %94  }
  0x77   :  { %394 = vst.msk [vmem:[%s897_s1 + $0x8] sm:$0xff] %vm96_vm2, %v116_v19  }
  0x78   :  { %97 = vst.msk [vmem:[%s897_s1] sm:$0xff] %vm96_vm2, %v95_v20  }
  0x79   :  { %184 = vst.msk [vmem:[%s897_s1] sm:$0xff] %vm183_vm3, %v182_v18  }
  0x7a   :  { %v214_v21 = vpop.permute.xlu2 %213  }
  0x7e   :  { %v127_v22 = vpop.permute.xlu1 %126   ;;  %v105_v23 = vpop.permute.xlu0 %104  }
  0x7f   :  { %397 = vst.msk [vmem:[%s897_s1 + $0x28] sm:$0xff] %vm96_vm2, %v127_v22  }
  0x80   :  { %420 = vst.msk [vmem:[%s897_s1 + $0x28] sm:$0xff] %vm183_vm3, %v214_v21  }
  0x81   :  { %391 = vst.msk [vmem:[%s897_s1 + $0x20] sm:$0xff] %vm96_vm2, %v105_v23  }
  0x82   :  { %v247_v24 = vpop.permute.xlu2 %246  }
  0x86   :  { %v171_v25 = vpop.permute.xlu1 %170   ;;  %v160_v26 = vpop.permute.xlu0 %159  }
  0x87   :  { %409 = vst.msk [vmem:[%s897_s1 + $0x38] sm:$0xff] %vm96_vm2, %v171_v25  }
  0x88   :  { %406 = vst.msk [vmem:[%s897_s1 + $0x18] sm:$0xff] %vm96_vm2, %v160_v26  }
  0x89   :  { %429 = vst.msk [vmem:[%s897_s1 + $0x18] sm:$0xff] %vm183_vm3, %v247_v24  }
  0x8a   :  { %v279_v27 = vpop.permute.xlu2 %278  }
  0x8e   :  { %v203_v28 = vpop.permute.xlu1 %202   ;;  %v192_v29 = vpop.permute.xlu0 %191  }
  0x8f   :  { %417 = vst.msk [vmem:[%s897_s1 + $0x8] sm:$0xff] %vm183_vm3, %v203_v28  }
  0x90   :  { %414 = vst.msk [vmem:[%s897_s1 + $0x20] sm:$0xff] %vm183_vm3, %v192_v29  }
  0x91   :  { %437 = vst.msk [vmem:[%s897_s1 + $0x20] sm:$0xff] %vm270_vm4, %v279_v27  }
  0x92   :  { %v312_v30 = vpop.permute.xlu2 %311  }
  0x96   :  { %v236_v31 = vpop.permute.xlu1 %235   ;;  %v225_v32 = vpop.permute.xlu0 %224  }
  0x97   :  { %426 = vst.msk [vmem:[%s897_s1 + $0x30] sm:$0xff] %vm183_vm3, %v236_v31  }
  0x98   :  { %423 = vst.msk [vmem:[%s897_s1 + $0x10] sm:$0xff] %vm183_vm3, %v225_v32  }
  0x99   :  { %446 = vst.msk [vmem:[%s897_s1 + $0x10] sm:$0xff] %vm270_vm4, %v312_v30  }
  0x9a   :  { %v345_v33 = vpop.permute.xlu2 %344  }
  0x9e   :  { %v269_v34 = vpop.permute.xlu1 %268   ;;  %v258_v35 = vpop.permute.xlu0 %257  }
  0x9f   :  { %271 = vst.msk [vmem:[%s897_s1] sm:$0xff] %vm270_vm4, %v269_v34  }
  0xa0   :  { %432 = vst.msk [vmem:[%s897_s1 + $0x38] sm:$0xff] %vm183_vm3, %v258_v35  }
  0xa1   :  { %455 = vst.msk [vmem:[%s897_s1 + $0x38] sm:$0xff] %vm270_vm4, %v345_v33  }
  0xa6   :  { %v301_v36 = vpop.permute.xlu1 %300   ;;  %v290_v37 = vpop.permute.xlu0 %289  }
  0xa7   :  { %443 = vst.msk [vmem:[%s897_s1 + $0x28] sm:$0xff] %vm270_vm4, %v301_v36  }
  0xa8   :  { %440 = vst.msk [vmem:[%s897_s1 + $0x8] sm:$0xff] %vm270_vm4, %v290_v37  }
  0xae   :  { %v334_v38 = vpop.permute.xlu1 %333   ;;  %v323_v39 = vpop.permute.xlu0 %322  }
  0xaf   :  { %452 = vst.msk [vmem:[%s897_s1 + $0x18] sm:$0xff] %vm270_vm4, %v334_v38  }
  0xb0   :  { %449 = vst.msk [vmem:[%s897_s1 + $0x30] sm:$0xff] %vm270_vm4, %v323_v39  }

// kernel: _fft_layer_call.1
= control target key start
LH: loop header
LB: loop body
LE: loop exit
PB: predicated region body
PF: predicated region fallthrough
CT: control target
= control target key end

     0   :  { %vm50_vm0 = vcmask 130048   ;;  %vm138_vm1 = vcmask 261120   ;;  %vm250_vm2 = vcmask 64512   ;;  %s888_s0 = inlined_call_operand.vmem [shape: f32[16,256], index: 0, kind: input, shape index: {}]   ;;  %s889_s1 = inlined_call_operand.vmem [shape: bf16[32,16], index: 1, kind: input, shape index: {}]   ;;  %s890_s4 = inlined_call_operand.vmem [shape: f32[256,8], index: 4, kind: input, shape index: {}]   ;;  %s891_s2 = inlined_call_operand.vmem [shape: f32[32,256], index: 2, kind: input, shape index: {}]   ;;  %s892_s3 = inlined_call_operand.vmem [shape: bf16[16,32], index: 3, kind: input, shape index: {}]   ;;  %s893_s5 = inlined_call_operand.vmem [shape: f32[8,256], index: 5, kind: input, shape index: {}]   ;;  %s894_s6 = inlined_call_operand.vmem [shape: f32[1,256], index: 6, kind: input, shape index: {}]   ;;  %s895_s7 = inlined_call_operand.vmem [shape: f32[1,256], index: 7, kind: input, shape index: {}]   ;;  %s896_s8 = inlined_call_operand.vmem [shape: f32[16,256], index: 8, kind: output, shape index: {}]  }
   0x1   :  { %v566_v0 = vld [vmem:[%s888_s0] sm:$0xff]  ;;  %v571_v1 = vld [vmem:[%s888_s0 + $0x10] sm:$0xff]  ;;  %v576_v2 = vld [vmem:[%s888_s0 + $0x8] sm:$0xff] }
   0x2   :  { %v38_v3 = vpack.c.bf16 %v571_v1, %v566_v0  ;;  %v583_v4 = vld [vmem:[%s888_s0 + $0x18] sm:$0xff]  ;;  %v507_v6 = vld [vmem:[%s889_s1] sm:$0xff]  ;;  %v508_v7 = vld [vmem:[%s889_s1 + $0x8] sm:$0xff] }
   0x3   :  { %v39_v5 = vpack.c.bf16 %v583_v4, %v576_v2  ;;  %v600_v10 = vld [vmem:[%s890_s4 + $0x78] sm:$0xff]  ;;  %v610_v12 = vld [vmem:[%s890_s4 + $0x70] sm:$0xff]  ;;  %v622_v16 = vld [vmem:[%s890_s4 + $0x68] sm:$0xff] }
   0x4   :  { %64 = vmatpush.bf16.msra.mxu0 %v38_v3  ;;  %v605_v11 = vld [vmem:[%s890_s4 + $0xf8] sm:$0xff]  ;;  %v617_v14 = vld [vmem:[%s890_s4 + $0xf0] sm:$0xff]  ;;  %v627_v17 = vld [vmem:[%s890_s4 + $0xe8] sm:$0xff] }
   0x5   :  { %83 = vmatpush.bf16.msra.mxu1 %v39_v5  ;;  %v634_v18 = vld [vmem:[%s890_s4 + $0x60] sm:$0xff]  ;;  %v646_v20 = vld [vmem:[%s890_s4 + $0x58] sm:$0xff]  ;;  %v658_v22 = vld [vmem:[%s890_s4 + $0x50] sm:$0xff] }
   0x6   :  { %v639_v19 = vld [vmem:[%s890_s4 + $0xe0] sm:$0xff]  ;;  %v651_v21 = vld [vmem:[%s890_s4 + $0xd8] sm:$0xff]  ;;  %v663_v23 = vld [vmem:[%s890_s4 + $0xd0] sm:$0xff] }
   0x7   :  { %489 = vmatmul.msk.bf16.vlgmr.msra.gmra.mxu0 %vm50_vm0, %v507_v6  ;;  %v670_v26 = vld [vmem:[%s890_s4 + $0x48] sm:$0xff]  ;;  %v682_v28 = vld [vmem:[%s890_s4 + $0x40] sm:$0xff]  ;;  %v703_v33 = vld [vmem:[%s890_s4 + $0x38] sm:$0xff] }
   0x8   :  { %491 = vmatmul.msk.bf16.vlgmr.msra.gmra.mxu1 %vm50_vm0, %v507_v6  ;;  %202 = vmatpush.msrb.mxu0 %v600_v10  ;;  %v675_v27 = vld [vmem:[%s890_s4 + $0xc8] sm:$0xff]  ;;  %v687_v29 = vld [vmem:[%s890_s4 + $0xc0] sm:$0xff]  ;;  %v708_v34 = vld [vmem:[%s890_s4 + $0xb8] sm:$0xff] }
   0x9   :  { %225 = vmatpush.msrb.mxu1 %v605_v11  ;;  %v95_v30 = vld [vmem:[%s891_s2] sm:$0xff]  ;;  %v100_v32 = vld [vmem:[%s891_s2 + $0x28] sm:$0xff]  ;;  %v97_v36 = vld [vmem:[%s891_s2 + $0x10] sm:$0xff] }
   0xa   :  { %203 = vmatpush.msrb.mxu0 %v610_v12  ;;  %v99_v31 = vld [vmem:[%s891_s2 + $0x20] sm:$0xff]  ;;  %v96_v35 = vld [vmem:[%s891_s2 + $0x8] sm:$0xff]  ;;  %v101_v37 = vld [vmem:[%s891_s2 + $0x30] sm:$0xff] }
   0xb   :  { %226 = vmatpush.msrb.mxu1 %v617_v14  ;;  %v102_v38 = vld [vmem:[%s891_s2 + $0x38] sm:$0xff]  ;;  %v727_v40 = vld [vmem:[%s890_s4 + $0x30] sm:$0xff]  ;;  %v744_v52 = vld [vmem:[%s890_s4 + $0x28] sm:$0xff] }
   0xc   :  { %204 = vmatpush.msrb.mxu0 %v622_v16  ;;  %v732_v41 = vld [vmem:[%s890_s4 + $0xb0] sm:$0xff]  ;;  %v98_v44 = vld [vmem:[%s891_s2 + $0x18] sm:$0xff]  ;;  %v749_v53 = vld [vmem:[%s890_s4 + $0xa8] sm:$0xff] }
   0xd   :  { %227 = vmatpush.msrb.mxu1 %v627_v17  ;;  %v756_v61 = vld [vmem:[%s890_s4 + $0x20] sm:$0xff] }
   0xe   :  { %205 = vmatpush.msrb.mxu0 %v634_v18  ;;  %v761_v62 = vld [vmem:[%s890_s4 + $0xa0] sm:$0xff] }
   0xf   :  { %228 = vmatpush.msrb.mxu1 %v639_v19 }
  0x10   :  { %206 = vmatpush.msrb.mxu0 %v646_v20 }
  0x11   :  { %229 = vmatpush.msrb.mxu1 %v651_v21 }
  0x12   :  { %207 = vmatpush.msrb.mxu0 %v658_v22 }
  0x13   :  { %230 = vmatpush.msrb.mxu1 %v663_v23 }
  0x14   :  { %208 = vmatpush.msrb.mxu0 %v670_v26 }
  0x15   :  { %231 = vmatpush.msrb.mxu1 %v675_v27 }
  0x16   :  { %209 = vmatpush.msrb.mxu0 %v682_v28 }
  0x17   :  { %490 = vmatmul.msk.bf16.gmra.mxu0 %vm50_vm0, %v508_v7  ;;  %232 = vmatpush.msrb.mxu1 %v687_v29 }
  0x18   :  { %492 = vmatmul.msk.bf16.gmra.mxu1 %vm50_vm0, %v508_v7  ;;  %210 = vmatpush.msrb.mxu0 %v703_v33 }
  0x19   :  { %233 = vmatpush.msrb.mxu1 %v708_v34 }
  0x1a   :  { %211 = vmatpush.msrb.mxu0 %v727_v40 }
  0x1b   :  { %234 = vmatpush.msrb.mxu1 %v732_v41 }
  0x1c   :  { %212 = vmatpush.msrb.mxu0 %v744_v52 }
  0x1d   :  { %235 = vmatpush.msrb.mxu1 %v749_v53 }
  0x1e   :  { %213 = vmatpush.msrb.mxu0 %v756_v61 }
  0x1f   :  { %236 = vmatpush.msrb.mxu1 %v761_v62 }
  0x84   :  { %v593_v8 = vpop.f32.mrf.mxu0 }
  0x85   :  { %v595_v9 = vpop.f32.mrf.mxu1  ;;  %v115_v42 = vmul.f32 %v99_v31, %v593_v8  ;;  %v103_v6 = vmul.f32 %v95_v30, %v593_v8 }
  0x86   :  { %v116_v43 = vmul.f32 %v100_v32, %v595_v9 }
  0x8c   :  { %v68_v13 = vpop.f32.mrf.mxu0 }
  0x8d   :  { %v87_v15 = vpop.f32.mrf.mxu1  ;;  %v105_v47 = vmul.f32 %v97_v36, %v68_v13  ;;  %v117_v48 = vmul.f32 %v101_v37, %v68_v13 }
  0x8e   :  { %v118_v54 = vmul.f32 %v102_v38, %v87_v15  ;;  %v106_v57 = vmul.f32 %v98_v44, %v87_v15  ;;  %v769_v15 = vld [vmem:[%s890_s4 + $0x18] sm:$0xff] }
  0x8f   :  { %214 = vmatpush.msrb.mxu0 %v769_v15 }
  0x94   :  { %v71_v24 = vpop.f32.mrf.mxu0 }
  0x95   :  { %v90_v25 = vpop.f32.mrf.mxu1  ;;  %v119_v39 = vmul.f32 %v95_v30, %v71_v24  ;;  %v107_v58 = vmul.f32 %v99_v31, %v71_v24  ;;  %v104_v24 = vmul.f32 %v96_v35, %v595_v9  ;;  %v782_v30 = vld [vmem:[%s890_s4 + $0x10] sm:$0xff] }
  0x96   :  { %v120_v45 = vmul.f32 %v96_v35, %v90_v25  ;;  %v108_v63 = vmul.f32 %v100_v32, %v90_v25  ;;  %v777_v25 = vld [vmem:[%s890_s4 + $0x98] sm:$0xff]  ;;  %v188_v32 = vld [vmem:[%s890_s4 + $0x90] sm:$0xff]  ;;  %215 = vmatpush.msrb.mxu0 %v782_v30 }
  0x97   :  { %v123_v59 = vadd.f32 %v119_v39, %v115_v42  ;;  %v111_v8 = vsub.f32 %v103_v6, %v107_v58  ;;  %237 = vmatpush.msrb.mxu1 %v777_v25  ;;  %v509_v39 = vld [vmem:[%s892_s3] sm:$0xff]  ;;  %v187_v42 = vld [vmem:[%s890_s4 + $0x88] sm:$0xff] }
  0x98   :  { %v124_v3 = vadd.f32 %v120_v45, %v116_v43  ;;  %v112_v9 = vsub.f32 %v104_v24, %v108_v63  ;;  %v170_v43 = vld [vmem:[%s890_s4] sm:$0xff] }
  0x99   :  { %238 = vmatpush.msrb.mxu1 %v188_v32  ;;  %v248_v45 = vld [vmem:[%s893_s5] sm:$0xff] }
  0x9b   :  { %239 = vmatpush.msrb.mxu1 %v187_v42 }
  0x9c   :  { %v73_v46 = vpop.f32.mrf.mxu0 }
  0x9d   :  { %v109_v49 = vmul.f32 %v101_v37, %v73_v46  ;;  %v121_v50 = vmul.f32 %v97_v36, %v73_v46  ;;  %v92_v51 = vpop.f32.mrf.mxu1  ;;  %v171_v37 = vld [vmem:[%s890_s4 + $0x8] sm:$0xff] }
  0x9e   :  { %v110_v55 = vmul.f32 %v102_v38, %v92_v51  ;;  %v122_v56 = vmul.f32 %v98_v44, %v92_v51  ;;  %216 = vmatpush.msrb.mxu0 %v171_v37  ;;  %v186_v44 = vld [vmem:[%s890_s4 + $0x80] sm:$0xff]  ;;  %v249_v46 = vld [vmem:[%s893_s5 + $0x8] sm:$0xff] }
  0x9f   :  { %v125_v60 = vadd.f32 %v121_v50, %v117_v48  ;;  %v113_v13 = vsub.f32 %v105_v47, %v109_v49  ;;  %240 = vmatpush.msrb.mxu1 %v186_v44 }
  0xa0   :  { %v126_v5 = vadd.f32 %v122_v56, %v118_v54  ;;  %v114_v36 = vsub.f32 %v106_v57, %v110_v55  ;;  %217 = vmatpush.msrb.mxu0 %v170_v43 }
  0xa1   :  { %v131_v7 = vpack.c.bf16 %v125_v60, %v123_v59  ;;  %v129_v35 = vpack.c.bf16 %v113_v13, %v111_v8  ;;  %401 = vmatpush.msra.mxu1 %v249_v46 }
  0xa2   :  { %v132_v31 = vpack.c.bf16 %v126_v5, %v124_v3  ;;  %v130_v38 = vpack.c.bf16 %v114_v36, %v112_v9  ;;  %378 = vmatpush.msra.mxu0 %v248_v45  ;;  %v453_v36 = vld [vmem:[%s894_s6] sm:$0x3] }
  0xa3   :  { %148 = vmatpush.bf16.msra.mxu2 %v131_v7 }
  0xa4   :  { %162 = vmatpush.bf16.msra.mxu3 %v132_v31 }
  0xa7   :  { %149 = vmatpush.bf16.msra.mxu2 %v129_v35 }
  0xa8   :  { %163 = vmatpush.bf16.msra.mxu3 %v130_v38 }
  0xaa   :  { %497 = vmatmul.msk.bf16.vlgmr.msra.gmra.mxu2 %vm138_vm1, %v509_v39 }
  0xab   :  { %498 = vmatmul.msk.bf16.vlgmr.msra.gmra.mxu3 %vm138_vm1, %v509_v39  ;;  %272 = vmatpush.msrb.mxu2 %v248_v45 }
  0xac   :  { %295 = vmatpush.msrb.mxu3 %v249_v46 }
  0xad   :  { %311 = vmatpush.msra.mxu2 %v600_v10 }
  0xae   :  { %334 = vmatpush.msra.mxu3 %v605_v11 }
  0xaf   :  { %312 = vmatpush.msra.mxu2 %v610_v12 }
  0xb0   :  { %335 = vmatpush.msra.mxu3 %v617_v14 }
  0xb1   :  { %313 = vmatpush.msra.mxu2 %v622_v16 }
  0xb2   :  { %336 = vmatpush.msra.mxu3 %v627_v17 }
  0xb3   :  { %314 = vmatpush.msra.mxu2 %v634_v18 }
  0xb4   :  { %337 = vmatpush.msra.mxu3 %v639_v19 }
  0xb5   :  { %315 = vmatpush.msra.mxu2 %v646_v20 }
  0xb6   :  { %338 = vmatpush.msra.mxu3 %v651_v21 }
  0xb7   :  { %316 = vmatpush.msra.mxu2 %v658_v22 }
  0xb8   :  { %339 = vmatpush.msra.mxu3 %v663_v23 }
  0xb9   :  { %317 = vmatpush.msra.mxu2 %v670_v26 }
  0xba   :  { %340 = vmatpush.msra.mxu3 %v675_v27 }
  0xbb   :  { %318 = vmatpush.msra.mxu2 %v682_v28 }
  0xbc   :  { %341 = vmatpush.msra.mxu3 %v687_v29 }
  0xbd   :  { %319 = vmatpush.msra.mxu2 %v703_v33 }
  0xbe   :  { %342 = vmatpush.msra.mxu3 %v708_v34 }
  0xbf   :  { %320 = vmatpush.msra.mxu2 %v727_v40 }
  0xc0   :  { %343 = vmatpush.msra.mxu3 %v732_v41 }
  0xc1   :  { %321 = vmatpush.msra.mxu2 %v744_v52 }
  0xc2   :  { %344 = vmatpush.msra.mxu3 %v749_v53 }
  0xc3   :  { %322 = vmatpush.msra.mxu2 %v756_v61 }
  0xc4   :  { %345 = vmatpush.msra.mxu3 %v761_v62 }
  0xc5   :  { %323 = vmatpush.msra.mxu2 %v769_v15 }
  0xc6   :  { %346 = vmatpush.msra.mxu3 %v777_v25 }
  0xc7   :  { %324 = vmatpush.msra.mxu2 %v782_v30 }
  0xc8   :  { %347 = vmatpush.msra.mxu3 %v188_v32  ;;  %v463_v32 = vld [vmem:[%s895_s7] sm:$0x3] }
  0xc9   :  { %325 = vmatpush.msra.mxu2 %v171_v37  ;;  %v455_v37 = vperm.slane %v453_v36, 0  ;;  %v465_v46 = vperm.slane %v463_v32, 0 }
  0xca   :  { %348 = vmatpush.msra.mxu3 %v187_v42 }
  0xcb   :  { %326 = vmatpush.msra.mxu2 %v170_v43  ;;  %v456_v43 = vperm.slane %v453_v36, 1 }
  0xcc   :  { %349 = vmatpush.msra.mxu3 %v186_v44 }
 0x12d   :  { %v151_v10 = vpop.f32.mrf.mxu2 }
 0x12e   :  { %v152_v11 = vadd.f32 %v151_v10, %v566_v0  ;;  %v165_v12 = vpop.f32.mrf.mxu3 }
 0x12f   :  { %v166_v14 = vadd.f32 %v165_v12, %v576_v2 }
 0x130   :  { %218 = vmatmul.f32.vlgmr.msrb.gmra.mxu0 %v152_v11 }
 0x131   :  { %241 = vmatmul.f32.vlgmr.msrb.gmra.mxu1 %v166_v14 }
 0x135   :  { %v153_v16 = vpop.f32.mrf.mxu2 }
 0x136   :  { %v154_v0 = vadd.f32 %v153_v16, %v571_v1  ;;  %v167_v2 = vpop.f32.mrf.mxu3 }
 0x137   :  { %v168_v17 = vadd.f32 %v167_v2, %v583_v4 }
 0x138   :  { %221 = vmatmul.f32.gmra.mxu0 %v154_v0 }
 0x139   :  { %244 = vmatmul.f32.gmra.mxu1 %v168_v17 }
 0x1ad   :  { %v219_v18 = vpop.f32.mrf.mxu0 }
 0x1ae   :  { %v242_v19 = vpop.f32.mrf.mxu1 }
 0x1af   :  { %v243_v20 = vadd.f32 %v242_v19, %v219_v18 }
 0x1b1   :  { %499 = vmatmul.msk.f32.vlgmr.msrb.gmra.mxu2 %vm250_vm2, %v243_v20  ;;  %501 = vmatmul.msk.f32.vlgmr.msrb.gmra.mxu3 %vm250_vm2, %v243_v20 }
 0x1b5   :  { %v222_v21 = vpop.f32.mrf.mxu0 }
 0x1b6   :  { %v245_v1 = vpop.f32.mrf.mxu1 }
 0x1b7   :  { %v246_v22 = vadd.f32 %v245_v1, %v222_v21 }
 0x1b9   :  { %500 = vmatmul.msk.f32.gmra.mxu2 %vm250_vm2, %v246_v22  ;;  %502 = vmatmul.msk.f32.gmra.mxu3 %vm250_vm2, %v246_v22 }
 0x234   :  { %v274_v4 = vpop.f32.mrf.mxu2  ;;  %v297_v23 = vpop.f32.mrf.mxu3 }
 0x235   :  { %v846_v26 = vsub.f32 %v152_v11, %v274_v4  ;;  %v848_v27 = vsub.f32 %v166_v14, %v297_v23  ;;  %v466_v14 = vperm.slane %v463_v32, 1 }
 0x237   :  { %v307_v28 = vmul.f32 %v846_v26, %v846_v26  ;;  %v308_v29 = vmul.f32 %v848_v27, %v848_v27 }
 0x239   :  { %327 = vmatmul.f32.vlgmr.msra.gmra.mxu2 %v307_v28  ;;  %350 = vmatmul.f32.vlgmr.msra.gmra.mxu3 %v308_v29 }
 0x23c   :  { %v277_v33 = vpop.f32.mrf.mxu2  ;;  %v300_v34 = vpop.f32.mrf.mxu3 }
 0x23d   :  { %v854_v40 = vsub.f32 %v154_v0, %v277_v33  ;;  %v856_v41 = vsub.f32 %v168_v17, %v300_v34 }
 0x23f   :  { %v309_v47 = vmul.f32 %v854_v40, %v854_v40  ;;  %v310_v48 = vmul.f32 %v856_v41, %v856_v41 }
 0x241   :  { %330 = vmatmul.f32.gmra.mxu2 %v309_v47  ;;  %353 = vmatmul.f32.gmra.mxu3 %v310_v48 }
 0x2bc   :  { %v328_v49 = vpop.f32.mrf.mxu2  ;;  %v351_v50 = vpop.f32.mrf.mxu3 }
 0x2bd   :  { %v352_v51 = vadd.f32 %v351_v50, %v328_v49 }
 0x2bf   :  { %503 = vmatmul.msk.f32.vlgmr.msra.gmra.mxu0 %vm250_vm2, %v352_v51  ;;  %505 = vmatmul.msk.f32.vlgmr.msra.gmra.mxu1 %vm250_vm2, %v352_v51 }
 0x2c4   :  { %v331_v52 = vpop.f32.mrf.mxu2  ;;  %v354_v53 = vpop.f32.mrf.mxu3 }
 0x2c5   :  { %v355_v54 = vadd.f32 %v354_v53, %v331_v52 }
 0x2c7   :  { %504 = vmatmul.msk.f32.gmra.mxu0 %vm250_vm2, %v355_v54  ;;  %506 = vmatmul.msk.f32.gmra.mxu1 %vm250_vm2, %v355_v54 }
 0x33c   :  { %v380_v55 = vpop.f32.mrf.mxu0  ;;  %v403_v56 = vpop.f32.mrf.mxu1 }
 0x33d   :  { %v381_v57 = vadd.f32 1e-12, %v380_v55  ;;  %v404_v58 = vadd.f32 1e-12, %v403_v56 }
 0x33f   :  { %510 = vrsqrt.f32 %v381_v57  ;;  %vm415_vm5 = vweird.f32 %v381_v57  ;;  %vm425_vm7 = vweird.f32 %v404_v58 }
 0x340   :  { %512 = vrsqrt.f32 %v404_v58 }
 0x344   :  { %v383_v59 = vpop.f32.mrf.mxu0  ;;  %v406_v60 = vpop.f32.mrf.mxu1 }
 0x345   :  { %v511_v61 = vpop.eup %510  ;;  %v384_v62 = vadd.f32 1e-12, %v383_v59  ;;  %v407_v63 = vadd.f32 1e-12, %v406_v60 }
 0x346   :  { %v513_v3 = vpop.eup %512  ;;  %v410_v5 = vmul.f32 %v511_v61, %v381_v57  ;;  %vm416_vm3 = vweird.f32 %v511_v61 }
 0x347   :  { %v420_v6 = vmul.f32 %v513_v3, %v404_v58  ;;  %514 = vrsqrt.f32 %v384_v62  ;;  %vm426_vm4 = vweird.f32 %v513_v3  ;;  %vm417_vm6 = vmor %vm415_vm5, %vm416_vm3  ;;  %vm435_vm11 = vweird.f32 %v384_v62 }
 0x348   :  { %v411_v7 = vmul.f32 %v511_v61, %v410_v5  ;;  %516 = vrsqrt.f32 %v407_v63  ;;  %vm427_vm8 = vmor %vm425_vm7, %vm426_vm4  ;;  %vm445_vm13 = vweird.f32 %v407_v63 }
 0x349   :  { %v421_v13 = vmul.f32 %v513_v3, %v420_v6 }
 0x34a   :  { %v412_v15 = vmul.f32 0.5, %v411_v7 }
 0x34b   :  { %v422_v24 = vmul.f32 0.5, %v421_v13 }
 0x34c   :  { %v413_v31 = vsub.f32 1.5, %v412_v15 }
 0x34d   :  { %v515_v25 = vpop.eup %514  ;;  %v423_v8 = vsub.f32 1.5, %v422_v24 }
 0x34e   :  { %v517_v30 = vpop.eup %516  ;;  %v414_v9 = vmul.f32 %v511_v61, %v413_v31  ;;  %v430_v35 = vmul.f32 %v515_v25, %v384_v62  ;;  %vm436_vm9 = vweird.f32 %v515_v25 }
 0x34f   :  { %v424_v38 = vmul.f32 %v513_v3, %v423_v8  ;;  %v440_v39 = vmul.f32 %v517_v30, %v407_v63  ;;  %vm446_vm10 = vweird.f32 %v517_v30  ;;  %vm437_vm12 = vmor %vm435_vm11, %vm436_vm9 }
 0x350   :  { %v418_v42 = vsel %vm417_vm6, %v511_v61, %v414_v9  ;;  %v431_v44 = vmul.f32 %v515_v25, %v430_v35  ;;  %vm447_vm14 = vmor %vm445_vm13, %vm446_vm10 }
 0x351   :  { %v449_v45 = vmul.f32 %v418_v42, %v846_v26  ;;  %v428_v10 = vsel %vm427_vm8, %v513_v3, %v424_v38  ;;  %v441_v11 = vmul.f32 %v517_v30, %v440_v39 }
 0x352   :  { %v450_v12 = vmul.f32 %v428_v10, %v848_v27  ;;  %v432_v16 = vmul.f32 0.5, %v431_v44 }
 0x353   :  { %v459_v0 = vmul.f32 %v455_v37, %v449_v45  ;;  %v442_v2 = vmul.f32 0.5, %v441_v11 }
 0x354   :  { %v460_v17 = vmul.f32 %v456_v43, %v450_v12  ;;  %v433_v18 = vsub.f32 1.5, %v432_v16 }
 0x355   :  { %v469_v19 = vadd.f32 %v465_v46, %v459_v0  ;;  %v443_v20 = vsub.f32 1.5, %v442_v2 }
 0x356   :  { %v470_v21 = vadd.f32 %v466_v14, %v460_v17  ;;  %v434_v1 = vmul.f32 %v515_v25, %v433_v18 }
 0x357   :  { %473 = vst [vmem:[%s896_s8] sm:$0xff] %v469_v19  ;;  %v444_v22 = vmul.f32 %v517_v30, %v443_v20 }
 0x358   :  { %474 = vst [vmem:[%s896_s8 + $0x8] sm:$0xff] %v470_v21  ;;  %v438_v4 = vsel %vm437_vm12, %v515_v25, %v434_v1 }
 0x359   :  { %v451_v23 = vmul.f32 %v438_v4, %v854_v40  ;;  %v448_v26 = vsel %vm447_vm14, %v517_v30, %v444_v22 }
 0x35a   :  { %v452_v27 = vmul.f32 %v448_v26, %v856_v41 }
 0x35b   :  { %v461_v28 = vmul.f32 %v455_v37, %v451_v23 }
 0x35c   :  { %v462_v29 = vmul.f32 %v456_v43, %v452_v27 }
 0x35d   :  { %v471_v33 = vadd.f32 %v465_v46, %v461_v28 }
 0x35e   :  { %v472_v34 = vadd.f32 %v466_v14, %v462_v29 }
 0x35f   :  { %475 = vst [vmem:[%s896_s8 + $0x10] sm:$0xff] %v471_v33 }
 0x360   :  { %476 = vst [vmem:[%s896_s8 + $0x18] sm:$0xff] %v472_v34 }

</bundles_post_ra>
